<compile_context>
chip_gen: v6e
topology: v6e:2x2x1
jax: 0.10.0
libtpu: 0.0.40
codegen_flags: <defaults>
</compile_context>

<pallas_src>
import functools
import math

import jax
import jax.numpy as jnp
from jax import lax
from jax.experimental import pallas as pl
from jax.experimental.pallas import tpu as pltpu


def _add_kernel(x_ref, wc_ref, bc_ref, f2_ref, fb_ref, out_ref,
                ypad_ref, col_ref, *, W, Kd, pad_l):
    """One grid step over a lane-dense chunk of the (lane-folded) batch.

    x_ref   : (64*H, L)        input chunk, batch folded into lanes (L = NB*W)
    wc_ref  : (64, 64*H)       fused channel-conv weight
    bc_ref  : (64, 1)          fused channel-conv bias (f32)
    f2_ref  : (32, 64*Kd)      fused fre-conv weight, im2col layout
    fb_ref  : (32, 1)          fused fre-conv bias (f32)
    out_ref : (32, L)          f32 output
    ypad_ref: (64, L + Kd - 1) scratch: y plus a Kd-1 lane halo (halo is never
                               consumed unmasked -> no zeroing needed)
    col_ref : (64*Kd, L)       scratch: im2col stack of shifted/masked y copies
    """
    L = out_ref.shape[-1]

    # ---- fused channel convs: both branches in one deep MXU pass ------------
    y = jnp.dot(wc_ref[...], x_ref[...], preferred_element_type=jnp.float32)
    y = (y + bc_ref[...]).astype(ypad_ref.dtype)                     # (64, L)

    # Write y into the interior of the halo scratch (halo left untouched;
    # every halo read below is killed by the boundary select).
    ypad_ref[:, pad_l:pad_l + L] = y

    # Lane position within each image (batch lives on the lane axis); hoisted.
    w_pos = lax.broadcasted_iota(jnp.int32, (1, L), 1) % W

    # ---- im2col: stack the Kd shifted / boundary-masked copies of y --------
    for di in range(Kd):                      # static unroll (Kd is small)
        d = di - pad_l                        # shift relative to 'same' center
        if d == 0:
            ys = y                            # interior slice == y, no mask
        else:
            ys = ypad_ref[:, di:di + L]       # (64, L) shifted view
            # single unsigned compare handles both out-of-image directions
            valid = (w_pos + d).astype(jnp.uint32) < jnp.uint32(W)
            ys = jnp.where(valid, ys, jnp.zeros((), ypad_ref.dtype))
        col_ref[di * 64:(di + 1) * 64, :] = ys

    # ---- fused fre convs: ONE (32, 64*Kd) @ (64*Kd, L) MXU pass -------------
    acc = jnp.dot(f2_ref[...], col_ref[...], preferred_element_type=jnp.float32)
    out_ref[...] = (acc + fb_ref[...]).astype(out_ref.dtype)


def _vmem_limit_bytes():
    """Scoped-VMEM limit: generation-aware (64 MiB on v7x, 128 MiB on v5e/v6e)."""
    try:
        total = pltpu.get_tpu_info().vmem_capacity_bytes
    except Exception:
        total = 64 * 1024 * 1024            # v7x-conservative fallback
    return min(int(total * 3 // 4), 100 * 1024 * 1024)


def _choose_chunk(N, W, CH, Kd, itemsize, vmem_limit):
    """Images per grid step: lane-dense (NB*W % 128 == 0) and VMEM-budgeted.

    Prefers ONE fat grid step (the op is overhead-bound at small sizes); only
    splits when a chunk would overflow the per-generation VMEM budget.
    """
    step = 128 // math.gcd(W, 128)                       # images per 128 lanes
    per_lane = (2 * CH * itemsize        # x block, double-buffered
                + 2 * 32 * 4             # out block (f32), double-buffered
                + 64 * itemsize          # y + halo scratch
                + 64 * Kd * itemsize)    # im2col scratch
    budget = int(vmem_limit * 0.8)                       # headroom: weights etc.
    max_lanes = max(128, (budget // per_lane) // 128 * 128)
    nb_budget = max(step, (max_lanes // W) // step * step)
    nb = min(nb_budget, -(-N // step) * step)            # never pad more than needed
    n_pad = -(-N // nb) * nb
    return nb, n_pad


def add_forward(x, params, *, compute_dtype=jnp.float32):
    """x: (N, 64, H, W) float32 (NCHW, like PyTorch).  Returns (N, 32, 1, W) f32.

    compute_dtype=jnp.bfloat16 is recommended on v6e/v7x (f32 accumulation kept).
    """
    N, C, H, W = x.shape
    assert C == 64
    CH = C * H

    # ---- fused channel-conv weights (trace time, tiny) ----------------------
    w1 = params["channel_conv1_w"].reshape(32, CH)       # (32, 64, H, 1) -> (32, CH)
    w2 = params["channel_conv2_w"].reshape(32, CH)
    wc = jnp.concatenate([w1, w2], axis=0).astype(compute_dtype)      # (64, CH)
    bc = jnp.concatenate([params["channel_conv1_b"],
                          params["channel_conv2_b"]], axis=0
                         ).reshape(64, 1).astype(jnp.float32)

    # ---- fused fre-conv weights: block-diagonal per tap, im2col layout ------
    f1w = params["fre_conv1_w"]                          # (16, 32, 1, K1)
    f2w = params["fre_conv2_w"]                          # (16, 32, 1, K2)
    K1, K2 = f1w.shape[-1], f2w.shape[-1]
    pl1, pl2 = (K1 - 1) // 2, (K2 - 1) // 2              # PyTorch 'same' left pads
    dmin = min(-pl1, -pl2)
    dmax = max(K1 - 1 - pl1, K2 - 1 - pl2)
    pad_l = -dmin
    Kd = dmax - dmin + 1

    F = jnp.zeros((Kd, 32, 64), jnp.float32)
    for di in range(Kd):
        d = di - pad_l
        t1 = d + pl1
        if 0 <= t1 < K1:
            F = F.at[di, 0:16, 0:32].set(f1w[:, :, 0, t1])
        t2 = d + pl2
        if 0 <= t2 < K2:
            F = F.at[di, 16:32, 32:64].set(f2w[:, :, 0, t2])
    # (Kd, 32, 64) -> (32, Kd*64): one 640-deep contraction instead of Kd shallow ones
    F2 = jnp.transpose(F, (1, 0, 2)).reshape(32, Kd * 64).astype(compute_dtype)
    fb = jnp.concatenate([params["fre_conv1_b"],
                          params["fre_conv2_b"]], axis=0
                         ).reshape(32, 1).astype(jnp.float32)

    # ---- lane-dense layout: fold batch into the lane axis, pad to 128 -------
    itemsize = jnp.dtype(compute_dtype).itemsize
    vmem_limit = _vmem_limit_bytes()
    NB, N_pad = _choose_chunk(N, W, CH, Kd, itemsize, vmem_limit)
    G = N_pad // NB
    L = NB * W

    xp = x if N_pad == N else jnp.pad(x, ((0, N_pad - N), (0, 0), (0, 0), (0, 0)))
    # TODO(synk): this transpose is an extra HBM pass; keep activations in
    # (CH, N*W) layout between layers (or fuse via allow_input_fusion) to avoid it.
    x2 = jnp.transpose(xp.reshape(N_pad, CH, W), (1, 0, 2)
                       ).reshape(CH, N_pad * W).astype(compute_dtype)

    kernel = functools.partial(_add_kernel, W=W, Kd=Kd, pad_l=pad_l)

    out2 = pl.pallas_call(
        kernel,
        out_shape=jax.ShapeDtypeStruct((32, N_pad * W), jnp.float32),
        grid_spec=pltpu.PrefetchScalarGridSpec(
            num_scalar_prefetch=0,
            grid=(G,),
            in_specs=[
                pl.BlockSpec((CH, L), lambda g: (0, g)),        # x (lane chunk)
                pl.BlockSpec((64, CH), lambda g: (0, 0)),       # fused channel W (grid-invariant)
                pl.BlockSpec((64, 1), lambda g: (0, 0)),        # fused channel b
                pl.BlockSpec((32, Kd * 64), lambda g: (0, 0)),  # fused fre W (im2col layout)
                pl.BlockSpec((32, 1), lambda g: (0, 0)),        # fused fre b
            ],
            out_specs=pl.BlockSpec((32, L), lambda g: (0, g)),
            scratch_shapes=[
                pltpu.VMEM((64, L + Kd - 1), compute_dtype),    # y + lane halo
                pltpu.VMEM((64 * Kd, L), compute_dtype),        # im2col slabs
            ],
        ),
        compiler_params=pltpu.CompilerParams(
            dimension_semantics=("parallel",),
            vmem_limit_bytes=vmem_limit,
        ),
    )(x2, wc, bc, F2, fb)

    # (32, N_pad*W) -> (N, 32, 1, W), dropping the dummy lane-padding images.
    out = out2.reshape(32, N_pad, W)[:, :N, :]
    return jnp.transpose(out, (1, 0, 2)).reshape(N, 32, 1, W)


def add_reference(x, params):
    """Plain-JAX reference using lax.conv_general_dilated (NCHW)."""
    dn = ("NCHW", "OIHW", "NCHW")
    prec = lax.Precision.HIGHEST

    y1 = lax.conv_general_dilated(x, params["channel_conv1_w"],
                                  window_strides=(1, 1), padding="VALID",
                                  dimension_numbers=dn, precision=prec)
    y1 = y1 + params["channel_conv1_b"][None, :, None, None]
    K1 = params["fre_conv1_w"].shape[-1]
    pl1 = (K1 - 1) // 2
    z1 = lax.conv_general_dilated(y1, params["fre_conv1_w"],
                                  window_strides=(1, 1),
                                  padding=((0, 0), (pl1, K1 - 1 - pl1)),
                                  dimension_numbers=dn, precision=prec)
    z1 = z1 + params["fre_conv1_b"][None, :, None, None]

    y2 = lax.conv_general_dilated(x, params["channel_conv2_w"],
                                  window_strides=(1, 1), padding="VALID",
                                  dimension_numbers=dn, precision=prec)
    y2 = y2 + params["channel_conv2_b"][None, :, None, None]
    K2 = params["fre_conv2_w"].shape[-1]
    pl2 = (K2 - 1) // 2
    z2 = lax.conv_general_dilated(y2, params["fre_conv2_w"],
                                  window_strides=(1, 1),
                                  padding=((0, 0), (pl2, K2 - 1 - pl2)),
                                  dimension_numbers=dn, precision=prec)
    z2 = z2 + params["fre_conv2_b"][None, :, None, None]
    return jnp.concatenate([z1, z2], axis=1)


def init_params(key, H):
    ks = jax.random.split(key, 8)
    scale = 0.05
    return {
        "channel_conv1_w": scale * jax.random.normal(ks[0], (32, 64, H, 1), jnp.float32),
        "channel_conv1_b": scale * jax.random.normal(ks[1], (32,), jnp.float32),
        "fre_conv1_w":     scale * jax.random.normal(ks[2], (16, 32, 1, 10), jnp.float32),
        "fre_conv1_b":     scale * jax.random.normal(ks[3], (16,), jnp.float32),
        "channel_conv2_w": scale * jax.random.normal(ks[4], (32, 64, H, 1), jnp.float32),
        "channel_conv2_b": scale * jax.random.normal(ks[5], (32,), jnp.float32),
        "fre_conv2_w":     scale * jax.random.normal(ks[6], (16, 32, 1, 5), jnp.float32),
        "fre_conv2_b":     scale * jax.random.normal(ks[7], (16,), jnp.float32),
    }


if __name__ == "__main__":
    # img_size = (H, W) = (8, 16); input NCHW = (2, 64, 8, 16)
    N, C, H, W = 2, 64, 8, 16
    key = jax.random.PRNGKey(0)
    kx, kp = jax.random.split(key)
    x = jax.random.normal(kx, (N, C, H, W), jnp.float32)
    params = init_params(kp, H)

    ref = jax.block_until_ready(add_reference(x, params))

    # f32 path (exact-parity default)
    out = jax.block_until_ready(add_forward(x, params))
    assert out.shape == (N, 32, 1, W), out.shape
    assert jnp.allclose(out, ref, atol=2e-3, rtol=2e-3), \
        float(jnp.max(jnp.abs(out - ref)))

    # bf16 path (recommended on v6e/v7x: full-rate MXU, half the HBM/VMEM traffic)
    out_bf16 = jax.block_until_ready(add_forward(x, params, compute_dtype=jnp.bfloat16))
    assert out_bf16.shape == (N, 32, 1, W), out_bf16.shape
    assert jnp.allclose(out_bf16, ref, atol=5e-2, rtol=5e-2), \
        float(jnp.max(jnp.abs(out_bf16 - ref)))

    print("KERNEL_OK")
</pallas_src>

<mosaic_0001>
module attributes {stable_mosaic.version = 11 : i64} {
  func.func @_add_kernel(%arg0: i32, %arg1: memref<512x128xf32, #tpu.memory_space<vmem>>, %arg2: memref<64x512xf32, #tpu.memory_space<vmem>>, %arg3: memref<64x1xf32, #tpu.memory_space<vmem>>, %arg4: memref<32x640xf32, #tpu.memory_space<vmem>>, %arg5: memref<32x1xf32, #tpu.memory_space<vmem>>, %arg6: memref<32x128xf32, #tpu.memory_space<vmem>>, %arg7: memref<64x137xf32, #tpu.memory_space<vmem>>, %arg8: memref<640x128xf32, #tpu.memory_space<vmem>>) attributes {dimension_semantics = [#tpu.dimension_semantics<parallel>], iteration_bounds = array<i64: 1>, scalar_prefetch = 0 : i64, scratch_operands = 2 : i64, tpu.core_type = #tpu.core_type<tc>, window_params = [{transform_indices = @transform_0, window_bounds = array<i64: 512, 128>}, {pipeline_mode = #tpu.pipeline_mode<synchronous>, transform_indices = @transform_1, window_bounds = array<i64: 64, 512>}, {pipeline_mode = #tpu.pipeline_mode<synchronous>, transform_indices = @transform_2, window_bounds = array<i64: 64, 1>}, {pipeline_mode = #tpu.pipeline_mode<synchronous>, transform_indices = @transform_3, window_bounds = array<i64: 32, 640>}, {pipeline_mode = #tpu.pipeline_mode<synchronous>, transform_indices = @transform_4, window_bounds = array<i64: 32, 1>}, {transform_indices = @transform_5, window_bounds = array<i64: 32, 128>}]} {
    %c0 = arith.constant 0 : index
    %c0_0 = arith.constant 0 : index
    %0 = vector.load %arg2[%c0, %c0_0] : memref<64x512xf32, #tpu.memory_space<vmem>>, vector<64x512xf32>
    %c0_1 = arith.constant 0 : index
    %c0_2 = arith.constant 0 : index
    %1 = vector.load %arg1[%c0_1, %c0_2] : memref<512x128xf32, #tpu.memory_space<vmem>>, vector<512x128xf32>
    %cst = arith.constant dense<0.000000e+00> : vector<64x128xf32>
    %2 = tpu.matmul %0, %1, %cst {dimension_numbers = #tpu.dot_dimension_numbers<[1], [0], [0], [1], [0, 0, 1, 1], [], []>} : vector<64x512xf32>, vector<512x128xf32>, vector<64x128xf32> -> vector<64x128xf32>
    %c0_3 = arith.constant 0 : index
    %c0_4 = arith.constant 0 : index
    %3 = vector.load %arg3[%c0_3, %c0_4] : memref<64x1xf32, #tpu.memory_space<vmem>>, vector<64x1xf32>
    %4 = vector.broadcast %3 : vector<64x1xf32> to vector<64x128xf32>
    %5 = arith.addf %2, %4 : vector<64x128xf32>
    %c0_5 = arith.constant 0 : index
    %c4 = arith.constant 4 : index
    %6 = vector.load %arg7[%c0_5, %c4] : memref<64x137xf32, #tpu.memory_space<vmem>>, vector<64x128xf32>
    tpu.vector_store %arg7[%c0_5, %c4], %5 {strides = array<i32>} : memref<64x137xf32, #tpu.memory_space<vmem>>, vector<64x128xf32>,
    %7 = tpu.iota {dimensions = array<i32: 1>} : vector<1x128xi32>
    %c16_i32 = arith.constant 16 : i32
    %c0_i32 = arith.constant 0 : i32
    %8 = arith.cmpi eq, %c16_i32, %c0_i32 : i32
    %c1_i32 = arith.constant 1 : i32
    %9 = arith.select %8, %c1_i32, %c16_i32 : i32
    %10 = vector.broadcast %9 : i32 to vector<1x128xi32>
    %11 = arith.remsi %7, %10 : vector<1x128xi32>
    %c0_i32_6 = arith.constant 0 : i32
    %12 = vector.broadcast %c0_i32_6 : i32 to vector<1x128xi32>
    %13 = arith.cmpi ne, %11, %12 : vector<1x128xi32>
    %c0_i32_7 = arith.constant 0 : i32
    %14 = vector.broadcast %c0_i32_7 : i32 to vector<1x128xi32>
    %15 = arith.cmpi slt, %11, %14 : vector<1x128xi32>
    %c0_i32_8 = arith.constant 0 : i32
    %16 = arith.cmpi slt, %9, %c0_i32_8 : i32
    %17 = vector.broadcast %16 : i1 to vector<1x128xi1>
    %18 = vector.broadcast %17 : vector<1x128xi1> to vector<1x128xi1>
    %19 = arith.xori %15, %18 : vector<1x128xi1>
    %20 = arith.andi %19, %13 : vector<1x128xi1>
    %21 = vector.broadcast %9 : i32 to vector<1x128xi32>
    %22 = arith.addi %11, %21 : vector<1x128xi32>
    %23 = arith.select %20, %22, %11 : vector<1x128xi1>, vector<1x128xi32>
    %c0_9 = arith.constant 0 : index
    %c0_10 = arith.constant 0 : index
    %24 = vector.load %arg7[%c0_9, %c0_10] : memref<64x137xf32, #tpu.memory_space<vmem>>, vector<64x128xf32>
    %c-4_i32 = arith.constant -4 : i32
    %25 = vector.broadcast %c-4_i32 : i32 to vector<1x128xi32>
    %26 = arith.addi %23, %25 : vector<1x128xi32>
    %c16_i32_11 = arith.constant 16 : i32
    %27 = vector.broadcast %c16_i32_11 : i32 to vector<1x128xi32>
    %28 = arith.cmpi ult, %26, %27 : vector<1x128xi32>
    %cst_12 = arith.constant 0.000000e+00 : f32
    %29 = vector.shape_cast %28 : vector<1x128xi1> to vector<1x128xi1>
    %30 = vector.broadcast %29 : vector<1x128xi1> to vector<64x128xi1>
    %31 = vector.broadcast %cst_12 : f32 to vector<64x128xf32>
    %32 = arith.select %30, %24, %31 : vector<64x128xi1>, vector<64x128xf32>
    %c0_13 = arith.constant 0 : index
    %c0_14 = arith.constant 0 : index
    %33 = vector.load %arg8[%c0_13, %c0_14] : memref<640x128xf32, #tpu.memory_space<vmem>>, vector<64x128xf32>
    tpu.vector_store %arg8[%c0_13, %c0_14], %32 {strides = array<i32>} : memref<640x128xf32, #tpu.memory_space<vmem>>, vector<64x128xf32>,
    %c0_15 = arith.constant 0 : index
    %c1 = arith.constant 1 : index
    %34 = vector.load %arg7[%c0_15, %c1] : memref<64x137xf32, #tpu.memory_space<vmem>>, vector<64x128xf32>
    %c-3_i32 = arith.constant -3 : i32
    %35 = vector.broadcast %c-3_i32 : i32 to vector<1x128xi32>
    %36 = arith.addi %23, %35 : vector<1x128xi32>
    %c16_i32_16 = arith.constant 16 : i32
    %37 = vector.broadcast %c16_i32_16 : i32 to vector<1x128xi32>
    %38 = arith.cmpi ult, %36, %37 : vector<1x128xi32>
    %cst_17 = arith.constant 0.000000e+00 : f32
    %39 = vector.shape_cast %38 : vector<1x128xi1> to vector<1x128xi1>
    %40 = vector.broadcast %39 : vector<1x128xi1> to vector<64x128xi1>
    %41 = vector.broadcast %cst_17 : f32 to vector<64x128xf32>
    %42 = arith.select %40, %34, %41 : vector<64x128xi1>, vector<64x128xf32>
    %c64 = arith.constant 64 : index
    %c0_18 = arith.constant 0 : index
    %43 = vector.load %arg8[%c64, %c0_18] : memref<640x128xf32, #tpu.memory_space<vmem>>, vector<64x128xf32>
    tpu.vector_store %arg8[%c64, %c0_18], %42 {strides = array<i32>} : memref<640x128xf32, #tpu.memory_space<vmem>>, vector<64x128xf32>,
    %c0_19 = arith.constant 0 : index
    %c2 = arith.constant 2 : index
    %44 = vector.load %arg7[%c0_19, %c2] : memref<64x137xf32, #tpu.memory_space<vmem>>, vector<64x128xf32>
    %c-2_i32 = arith.constant -2 : i32
    %45 = vector.broadcast %c-2_i32 : i32 to vector<1x128xi32>
    %46 = arith.addi %23, %45 : vector<1x128xi32>
    %c16_i32_20 = arith.constant 16 : i32
    %47 = vector.broadcast %c16_i32_20 : i32 to vector<1x128xi32>
    %48 = arith.cmpi ult, %46, %47 : vector<1x128xi32>
    %cst_21 = arith.constant 0.000000e+00 : f32
    %49 = vector.shape_cast %48 : vector<1x128xi1> to vector<1x128xi1>
    %50 = vector.broadcast %49 : vector<1x128xi1> to vector<64x128xi1>
    %51 = vector.broadcast %cst_21 : f32 to vector<64x128xf32>
    %52 = arith.select %50, %44, %51 : vector<64x128xi1>, vector<64x128xf32>
    %c128 = arith.constant 128 : index
    %c0_22 = arith.constant 0 : index
    %53 = vector.load %arg8[%c128, %c0_22] : memref<640x128xf32, #tpu.memory_space<vmem>>, vector<64x128xf32>
    tpu.vector_store %arg8[%c128, %c0_22], %52 {strides = array<i32>} : memref<640x128xf32, #tpu.memory_space<vmem>>, vector<64x128xf32>,
    %c0_23 = arith.constant 0 : index
    %c3 = arith.constant 3 : index
    %54 = vector.load %arg7[%c0_23, %c3] : memref<64x137xf32, #tpu.memory_space<vmem>>, vector<64x128xf32>
    %c-1_i32 = arith.constant -1 : i32
    %55 = vector.broadcast %c-1_i32 : i32 to vector<1x128xi32>
    %56 = arith.addi %23, %55 : vector<1x128xi32>
    %c16_i32_24 = arith.constant 16 : i32
    %57 = vector.broadcast %c16_i32_24 : i32 to vector<1x128xi32>
    %58 = arith.cmpi ult, %56, %57 : vector<1x128xi32>
    %cst_25 = arith.constant 0.000000e+00 : f32
    %59 = vector.shape_cast %58 : vector<1x128xi1> to vector<1x128xi1>
    %60 = vector.broadcast %59 : vector<1x128xi1> to vector<64x128xi1>
    %61 = vector.broadcast %cst_25 : f32 to vector<64x128xf32>
    %62 = arith.select %60, %54, %61 : vector<64x128xi1>, vector<64x128xf32>
    %c192 = arith.constant 192 : index
    %c0_26 = arith.constant 0 : index
    %63 = vector.load %arg8[%c192, %c0_26] : memref<640x128xf32, #tpu.memory_space<vmem>>, vector<64x128xf32>
    tpu.vector_store %arg8[%c192, %c0_26], %62 {strides = array<i32>} : memref<640x128xf32, #tpu.memory_space<vmem>>, vector<64x128xf32>,
    %c256 = arith.constant 256 : index
    %c0_27 = arith.constant 0 : index
    %64 = vector.load %arg8[%c256, %c0_27] : memref<640x128xf32, #tpu.memory_space<vmem>>, vector<64x128xf32>
    tpu.vector_store %arg8[%c256, %c0_27], %5 {strides = array<i32>} : memref<640x128xf32, #tpu.memory_space<vmem>>, vector<64x128xf32>,
    %c0_28 = arith.constant 0 : index
    %c5 = arith.constant 5 : index
    %65 = vector.load %arg7[%c0_28, %c5] : memref<64x137xf32, #tpu.memory_space<vmem>>, vector<64x128xf32>
    %c1_i32_29 = arith.constant 1 : i32
    %66 = vector.broadcast %c1_i32_29 : i32 to vector<1x128xi32>
    %67 = arith.addi %23, %66 : vector<1x128xi32>
    %c16_i32_30 = arith.constant 16 : i32
    %68 = vector.broadcast %c16_i32_30 : i32 to vector<1x128xi32>
    %69 = arith.cmpi ult, %67, %68 : vector<1x128xi32>
    %cst_31 = arith.constant 0.000000e+00 : f32
    %70 = vector.shape_cast %69 : vector<1x128xi1> to vector<1x128xi1>
    %71 = vector.broadcast %70 : vector<1x128xi1> to vector<64x128xi1>
    %72 = vector.broadcast %cst_31 : f32 to vector<64x128xf32>
    %73 = arith.select %71, %65, %72 : vector<64x128xi1>, vector<64x128xf32>
    %c320 = arith.constant 320 : index
    %c0_32 = arith.constant 0 : index
    %74 = vector.load %arg8[%c320, %c0_32] : memref<640x128xf32, #tpu.memory_space<vmem>>, vector<64x128xf32>
    tpu.vector_store %arg8[%c320, %c0_32], %73 {strides = array<i32>} : memref<640x128xf32, #tpu.memory_space<vmem>>, vector<64x128xf32>,
    %c0_33 = arith.constant 0 : index
    %c6 = arith.constant 6 : index
    %75 = vector.load %arg7[%c0_33, %c6] : memref<64x137xf32, #tpu.memory_space<vmem>>, vector<64x128xf32>
    %c2_i32 = arith.constant 2 : i32
    %76 = vector.broadcast %c2_i32 : i32 to vector<1x128xi32>
    %77 = arith.addi %23, %76 : vector<1x128xi32>
    %c16_i32_34 = arith.constant 16 : i32
    %78 = vector.broadcast %c16_i32_34 : i32 to vector<1x128xi32>
    %79 = arith.cmpi ult, %77, %78 : vector<1x128xi32>
    %cst_35 = arith.constant 0.000000e+00 : f32
    %80 = vector.shape_cast %79 : vector<1x128xi1> to vector<1x128xi1>
    %81 = vector.broadcast %80 : vector<1x128xi1> to vector<64x128xi1>
    %82 = vector.broadcast %cst_35 : f32 to vector<64x128xf32>
    %83 = arith.select %81, %75, %82 : vector<64x128xi1>, vector<64x128xf32>
    %c384 = arith.constant 384 : index
    %c0_36 = arith.constant 0 : index
    %84 = vector.load %arg8[%c384, %c0_36] : memref<640x128xf32, #tpu.memory_space<vmem>>, vector<64x128xf32>
    tpu.vector_store %arg8[%c384, %c0_36], %83 {strides = array<i32>} : memref<640x128xf32, #tpu.memory_space<vmem>>, vector<64x128xf32>,
    %c0_37 = arith.constant 0 : index
    %c7 = arith.constant 7 : index
    %85 = vector.load %arg7[%c0_37, %c7] : memref<64x137xf32, #tpu.memory_space<vmem>>, vector<64x128xf32>
    %c3_i32 = arith.constant 3 : i32
    %86 = vector.broadcast %c3_i32 : i32 to vector<1x128xi32>
    %87 = arith.addi %23, %86 : vector<1x128xi32>
    %c16_i32_38 = arith.constant 16 : i32
    %88 = vector.broadcast %c16_i32_38 : i32 to vector<1x128xi32>
    %89 = arith.cmpi ult, %87, %88 : vector<1x128xi32>
    %cst_39 = arith.constant 0.000000e+00 : f32
    %90 = vector.shape_cast %89 : vector<1x128xi1> to vector<1x128xi1>
    %91 = vector.broadcast %90 : vector<1x128xi1> to vector<64x128xi1>
    %92 = vector.broadcast %cst_39 : f32 to vector<64x128xf32>
    %93 = arith.select %91, %85, %92 : vector<64x128xi1>, vector<64x128xf32>
    %c448 = arith.constant 448 : index
    %c0_40 = arith.constant 0 : index
    %94 = vector.load %arg8[%c448, %c0_40] : memref<640x128xf32, #tpu.memory_space<vmem>>, vector<64x128xf32>
    tpu.vector_store %arg8[%c448, %c0_40], %93 {strides = array<i32>} : memref<640x128xf32, #tpu.memory_space<vmem>>, vector<64x128xf32>,
    %c0_41 = arith.constant 0 : index
    %c8 = arith.constant 8 : index
    %95 = vector.load %arg7[%c0_41, %c8] : memref<64x137xf32, #tpu.memory_space<vmem>>, vector<64x128xf32>
    %c4_i32 = arith.constant 4 : i32
    %96 = vector.broadcast %c4_i32 : i32 to vector<1x128xi32>
    %97 = arith.addi %23, %96 : vector<1x128xi32>
    %c16_i32_42 = arith.constant 16 : i32
    %98 = vector.broadcast %c16_i32_42 : i32 to vector<1x128xi32>
    %99 = arith.cmpi ult, %97, %98 : vector<1x128xi32>
    %cst_43 = arith.constant 0.000000e+00 : f32
    %100 = vector.shape_cast %99 : vector<1x128xi1> to vector<1x128xi1>
    %101 = vector.broadcast %100 : vector<1x128xi1> to vector<64x128xi1>
    %102 = vector.broadcast %cst_43 : f32 to vector<64x128xf32>
    %103 = arith.select %101, %95, %102 : vector<64x128xi1>, vector<64x128xf32>
    %c512 = arith.constant 512 : index
    %c0_44 = arith.constant 0 : index
    %104 = vector.load %arg8[%c512, %c0_44] : memref<640x128xf32, #tpu.memory_space<vmem>>, vector<64x128xf32>
    tpu.vector_store %arg8[%c512, %c0_44], %103 {strides = array<i32>} : memref<640x128xf32, #tpu.memory_space<vmem>>, vector<64x128xf32>,
    %c0_45 = arith.constant 0 : index
    %c9 = arith.constant 9 : index
    %105 = vector.load %arg7[%c0_45, %c9] : memref<64x137xf32, #tpu.memory_space<vmem>>, vector<64x128xf32>
    %c5_i32 = arith.constant 5 : i32
    %106 = vector.broadcast %c5_i32 : i32 to vector<1x128xi32>
    %107 = arith.addi %23, %106 : vector<1x128xi32>
    %c16_i32_46 = arith.constant 16 : i32
    %108 = vector.broadcast %c16_i32_46 : i32 to vector<1x128xi32>
    %109 = arith.cmpi ult, %107, %108 : vector<1x128xi32>
    %cst_47 = arith.constant 0.000000e+00 : f32
    %110 = vector.shape_cast %109 : vector<1x128xi1> to vector<1x128xi1>
    %111 = vector.broadcast %110 : vector<1x128xi1> to vector<64x128xi1>
    %112 = vector.broadcast %cst_47 : f32 to vector<64x128xf32>
    %113 = arith.select %111, %105, %112 : vector<64x128xi1>, vector<64x128xf32>
    %c576 = arith.constant 576 : index
    %c0_48 = arith.constant 0 : index
    %114 = vector.load %arg8[%c576, %c0_48] : memref<640x128xf32, #tpu.memory_space<vmem>>, vector<64x128xf32>
    tpu.vector_store %arg8[%c576, %c0_48], %113 {strides = array<i32>} : memref<640x128xf32, #tpu.memory_space<vmem>>, vector<64x128xf32>,
    %c0_49 = arith.constant 0 : index
    %c0_50 = arith.constant 0 : index
    %115 = vector.load %arg4[%c0_49, %c0_50] : memref<32x640xf32, #tpu.memory_space<vmem>>, vector<32x640xf32>
    %c0_51 = arith.constant 0 : index
    %c0_52 = arith.constant 0 : index
    %116 = vector.load %arg8[%c0_51, %c0_52] : memref<640x128xf32, #tpu.memory_space<vmem>>, vector<640x128xf32>
    %cst_53 = arith.constant dense<0.000000e+00> : vector<32x128xf32>
    %117 = tpu.matmul %115, %116, %cst_53 {dimension_numbers = #tpu.dot_dimension_numbers<[1], [0], [0], [1], [0, 0, 1, 1], [], []>} : vector<32x640xf32>, vector<640x128xf32>, vector<32x128xf32> -> vector<32x128xf32>
    %c0_54 = arith.constant 0 : index
    %c0_55 = arith.constant 0 : index
    %118 = vector.load %arg5[%c0_54, %c0_55] : memref<32x1xf32, #tpu.memory_space<vmem>>, vector<32x1xf32>
    %119 = vector.broadcast %118 : vector<32x1xf32> to vector<32x128xf32>
    %120 = arith.addf %117, %119 : vector<32x128xf32>
    %c0_56 = arith.constant 0 : index
    %c0_57 = arith.constant 0 : index
    %121 = vector.load %arg6[%c0_56, %c0_57] : memref<32x128xf32, #tpu.memory_space<vmem>>, vector<32x128xf32>
    tpu.vector_store %arg6[%c0_56, %c0_57], %120 {strides = array<i32>} : memref<32x128xf32, #tpu.memory_space<vmem>>, vector<32x128xf32>,
    return
  }
  func.func @transform_0(%arg0: i32) -> (i32, i32) {
    %c0_i32 = arith.constant 0 : i32
    %c0_i32_0 = arith.constant 0 : i32
    return %c0_i32, %arg0 : i32, i32
  }
  func.func @transform_1(%arg0: i32) -> (i32, i32) {
    %c0_i32 = arith.constant 0 : i32
    %c0_i32_0 = arith.constant 0 : i32
    %c0_i32_1 = arith.constant 0 : i32
    return %c0_i32, %c0_i32_0 : i32, i32
  }
  func.func @transform_2(%arg0: i32) -> (i32, i32) {
    %c0_i32 = arith.constant 0 : i32
    %c0_i32_0 = arith.constant 0 : i32
    %c0_i32_1 = arith.constant 0 : i32
    return %c0_i32, %c0_i32_0 : i32, i32
  }
  func.func @transform_3(%arg0: i32) -> (i32, i32) {
    %c0_i32 = arith.constant 0 : i32
    %c0_i32_0 = arith.constant 0 : i32
    %c0_i32_1 = arith.constant 0 : i32
    return %c0_i32, %c0_i32_0 : i32, i32
  }
  func.func @transform_4(%arg0: i32) -> (i32, i32) {
    %c0_i32 = arith.constant 0 : i32
    %c0_i32_0 = arith.constant 0 : i32
    %c0_i32_1 = arith.constant 0 : i32
    return %c0_i32, %c0_i32_0 : i32, i32
  }
  func.func @transform_5(%arg0: i32) -> (i32, i32) {
    %c0_i32 = arith.constant 0 : i32
    %c0_i32_0 = arith.constant 0 : i32
    return %c0_i32, %arg0 : i32, i32
  }
}

</mosaic_0001>

<bundles_post_ra>
// kernel: tpu_custom_call.1
= control target key start
LH: loop header
LB: loop body
LE: loop exit
PB: predicated region body
PF: predicated region fallthrough
CT: control target
= control target key end

     0   :  { %10 = vsyncpa [#allocation5], 0  ;;  %s3226_s0 = inlined_call_operand.hbm [shape: f32[512,128], index: 0, kind: input, shape index: {}]   ;;  %s3227_s1 = inlined_call_operand.hbm [shape: f32[64,512], index: 1, kind: input, shape index: {}]   ;;  %s3228_s2 = inlined_call_operand.vmem [shape: f32[64,1], index: 2, kind: input, shape index: {}]   ;;  %s3229_s3 = inlined_call_operand.hbm [shape: f32[32,640], index: 3, kind: input, shape index: {}]   ;;  %s3230_s4 = inlined_call_operand.vmem [shape: f32[32,1], index: 4, kind: input, shape index: {}]   ;;  %s3231_s5 = inlined_call_operand.hbm [shape: f32[32,128], index: 5, kind: output, shape index: {}]  }
   0x1   :  { %11 = vsyncpa [#allocation8], 0 }
   0x2   :  { %12 = vsyncpa [#allocation6], 0  ;;  %s2195_s18 = smov [#allocation7]  }
   0x3   :  { %s30_s19 = sshll.u32 %s2195_s18, 4  ;;  %s31_s19 = int_to_ptr.vmem [resolvable:$true] %s30_s19 }
   0x4   :  { %s2117_s20 = scalar_lea.vmem %s31_s19, 4096  ;;  %p2122_p1 = scmp.lt.s32.totalorder %s31_s19, %s31_s19 }
   0x5   :  { %p2118_p0 = scmp.ne.s32.totalorder %s31_s19, %s2117_s20  ;;  %p2123_p2 = scmp.lt.s32.totalorder %s2117_s20, %s2117_s20 }
   0x7   :  { %p2124_p3 = por %p2123_p2, %p2122_p1 }
   0x9   :  { %p2125_p4 = pnand %p2124_p3, %p2118_p0 }
   0xb   :  { %2128 = shalt.err (!%p2125_p4)
}
   0xc   :  { %s2196_s21 = smov 512   ;;  %s2197_s22 = smov 32  }
   0xd   :  { %36 = dma.hbm_to_vmem [thread:$0]  %s3227_s1, 4096, %s31_s19, [#allocation8], %s2196_s21, %s2196_s21, %s2197_s22  }
   0xe   :  { %s2198_s25 = smov [#allocation4]  }
   0xf   :  { %s18_s26 = sshll.u32 %s2198_s25, 4  ;;  %s19_s26 = int_to_ptr.vmem [resolvable:$true] %s18_s26 }
  0x10   :  { %s2137_s27 = scalar_lea.vmem %s19_s26, 8192  ;;  %p2142_p6 = scmp.lt.s32.totalorder %s19_s26, %s19_s26 }
  0x11   :  { %p2138_p5 = scmp.ne.s32.totalorder %s19_s26, %s2137_s27  ;;  %p2143_p7 = scmp.lt.s32.totalorder %s2137_s27, %s2137_s27 }
  0x13   :  { %p2144_p8 = por %p2143_p7, %p2142_p6 }
  0x15   :  { %p2145_p9 = pnand %p2144_p8, %p2138_p5 }
  0x17   :  { %2148 = shalt.err (!%p2145_p9)
}
  0x18   :  { %s2199_s28 = smov 128   ;;  %s2200_s29 = smov 8  }
  0x19   :  { %24 = dma.hbm_to_vmem [thread:$0]  %s3226_s0, 8192, %s19_s26, [#allocation5], %s2199_s28, %s2199_s28, %s2200_s29  }
  0x1a   :  { %s2201_s1 = smov [#allocation9]  }
  0x1b   :  { %s44_s7 = sshll.u32 %s2201_s1, 4  ;;  %s45_s7 = int_to_ptr.vmem [resolvable:$true] %s44_s7 }
  0x1c   :  { %s2157_s8 = scalar_lea.vmem %s45_s7, 2560  ;;  %p2162_p11 = scmp.lt.s32.totalorder %s45_s7, %s45_s7 }
  0x1d   :  { %p2158_p10 = scmp.ne.s32.totalorder %s45_s7, %s2157_s8  ;;  %p2163_p12 = scmp.lt.s32.totalorder %s2157_s8, %s2157_s8 }
  0x1f   :  { %p2164_p13 = por %p2163_p12, %p2162_p11 }
  0x21   :  { %p2165_p0 = pnand %p2164_p13, %p2158_p10 }
  0x23   :  { %2168 = shalt.err (!%p2165_p0)
}
  0x24   :  { %s2202_s9 = smov 640   ;;  %s2203_s10 = smov 40  }
  0x25   :  { %50 = dma.hbm_to_vmem [thread:$0]  %s3229_s3, 2560, %s45_s7, [#allocation8], %s2202_s9, %s2202_s9, %s2203_s10  }
  0x26   :  { %2189 = dma.done.wait [#allocation5], 8192  }
  0x27   :  { %2190 = vsyncadd [#allocation5], 4294959104 }
  0x28   :  { %2191 = dma.done.wait [#allocation8], 6656  }
  0x29   :  { %2192 = vsyncadd [#allocation8], 4294960640  ;;  %v2204_v0 = vmov 0   ;;  %v125_v1 = vld [vmem:[#allocation4 + $0xf8] sm:$0xff]  ;;  %v124_v5 = vld [vmem:[#allocation4 + $0xf0] sm:$0xff]  ;;  %vm448_vm0 = vcmask 1047584  }
  0x2a   :  { %2108 = vset.pattern.permute.xlu1 %v2204_v0  ;;  %2107 = vset.pattern.permute.xlu0 %v2204_v0  ;;  %v157_v2 = vld [vmem:[#allocation4 + $0x1f8] sm:$0xff]  ;;  %v156_v6 = vld [vmem:[#allocation4 + $0x1f0] sm:$0xff]  ;;  %v123_v9 = vld [vmem:[#allocation4 + $0xe8] sm:$0xff]  ;;  %vm450_vm1 = vcmask 31744   ;;  %s2206_s27 = smov 125   ;;  %s2207_s30 = smov 121  }
  0x2b   :  { %v109_v3 = vld [vmem:[#allocation4 + $0x78] sm:$0xff]  ;;  %1797 = vmatprep.subr.mxu0 %v125_v1  ;;  %1853 = vmatprep.subr.mxu1 %v157_v2  ;;  %v108_v7 = vld [vmem:[#allocation4 + $0x70] sm:$0xff]  ;;  %v155_v10 = vld [vmem:[#allocation4 + $0x1e8] sm:$0xff]  ;;  %s2208_s6 = smov 127   ;;  %s2209_s1 = smov 123   ;;  %vm988_vm2 = vcmask 998400  }
  0x2c   :  { %v141_v4 = vld [vmem:[#allocation4 + $0x178] sm:$0xff]  ;;  %1798 = vmatpush3.msra.mxu0 %v109_v3  ;;  %v140_v8 = vld [vmem:[#allocation4 + $0x170] sm:$0xff]  ;;  %v107_v11 = vld [vmem:[#allocation4 + $0x68] sm:$0xff]  ;;  %s2210_s7 = smov 126   ;;  %s2211_s8 = smov 122   ;;  %vm778_vm3 = vcmask 1022976  }
  0x2d   :  { %1854 = vmatpush3.msra.mxu1 %v141_v4  ;;  %1799 = vmatprep.subr.mxu0 %v124_v5  ;;  %v139_v12 = vld [vmem:[#allocation4 + $0x168] sm:$0xff]  ;;  %v122_v13 = vld [vmem:[#allocation4 + $0xe0] sm:$0xff]  ;;  %v121_v17 = vld [vmem:[#allocation4 + $0xd8] sm:$0xff]  ;;  %s2212_s9 = smov 119   ;;  %vm1089_vm4 = vcmask 990208   ;;  %vm576_vm5 = vcmask 1039360  }
  0x2e   :  { %1855 = vmatprep.subr.mxu1 %v156_v6  ;;  %1800 = vmatpush3.msra.mxu0 %v108_v7  ;;  %v154_v14 = vld [vmem:[#allocation4 + $0x1e0] sm:$0xff]  ;;  %v153_v18 = vld [vmem:[#allocation4 + $0x1d8] sm:$0xff]  ;;  %v120_v21 = vld [vmem:[#allocation4 + $0xd0] sm:$0xff]  ;;  %vm887_vm6 = vcmask 1006592   ;;  %vm677_vm7 = vcmask 1031168   ;;  %s2213_s10 = smov 120  }
  0x2f   :  { %1856 = vmatpush3.msra.mxu1 %v140_v8  ;;  %1801 = vmatprep.subr.mxu0 %v123_v9  ;;  %v106_v15 = vld [vmem:[#allocation4 + $0x60] sm:$0xff]  ;;  %v105_v19 = vld [vmem:[#allocation4 + $0x58] sm:$0xff]  ;;  %v152_v22 = vld [vmem:[#allocation4 + $0x1d0] sm:$0xff]  ;;  %vm1291_vm8 = vcmask 973824  }
  0x30   :  { %1857 = vmatprep.subr.mxu1 %v155_v10  ;;  %v138_v16 = vld [vmem:[#allocation4 + $0x160] sm:$0xff]  ;;  %1802 = vmatpush3.msra.mxu0 %v107_v11  ;;  %v137_v20 = vld [vmem:[#allocation4 + $0x158] sm:$0xff]  ;;  %v104_v23 = vld [vmem:[#allocation4 + $0x50] sm:$0xff] }
  0x31   :  { %1858 = vmatpush3.msra.mxu1 %v139_v12  ;;  %1803 = vmatprep.subr.mxu0 %v122_v13  ;;  %v136_v24 = vld [vmem:[#allocation4 + $0x150] sm:$0xff]  ;;  %v119_v25 = vld [vmem:[#allocation4 + $0xc8] sm:$0xff]  ;;  %v118_v29 = vld [vmem:[#allocation4 + $0xc0] sm:$0xff] }
  0x32   :  { %1859 = vmatprep.subr.mxu1 %v154_v14  ;;  %1804 = vmatpush3.msra.mxu0 %v106_v15  ;;  %v151_v26 = vld [vmem:[#allocation4 + $0x1c8] sm:$0xff]  ;;  %v150_v30 = vld [vmem:[#allocation4 + $0x1c0] sm:$0xff]  ;;  %v117_v33 = vld [vmem:[#allocation4 + $0xb8] sm:$0xff] }
  0x33   :  { %1860 = vmatpush3.msra.mxu1 %v138_v16  ;;  %1805 = vmatprep.subr.mxu0 %v121_v17  ;;  %v103_v27 = vld [vmem:[#allocation4 + $0x48] sm:$0xff]  ;;  %v102_v31 = vld [vmem:[#allocation4 + $0x40] sm:$0xff]  ;;  %v149_v34 = vld [vmem:[#allocation4 + $0x1b8] sm:$0xff] }
  0x34   :  { %1861 = vmatprep.subr.mxu1 %v153_v18  ;;  %1806 = vmatpush3.msra.mxu0 %v105_v19  ;;  %v135_v28 = vld [vmem:[#allocation4 + $0x148] sm:$0xff]  ;;  %v134_v32 = vld [vmem:[#allocation4 + $0x140] sm:$0xff]  ;;  %v101_v35 = vld [vmem:[#allocation4 + $0x38] sm:$0xff] }
  0x35   :  { %1862 = vmatpush3.msra.mxu1 %v137_v20  ;;  %1807 = vmatprep.subr.mxu0 %v120_v21  ;;  %v133_v36 = vld [vmem:[#allocation4 + $0x138] sm:$0xff]  ;;  %v116_v37 = vld [vmem:[#allocation4 + $0xb0] sm:$0xff]  ;;  %v115_v41 = vld [vmem:[#allocation4 + $0xa8] sm:$0xff] }
  0x36   :  { %1863 = vmatprep.subr.mxu1 %v152_v22  ;;  %1808 = vmatpush3.msra.mxu0 %v104_v23  ;;  %v148_v38 = vld [vmem:[#allocation4 + $0x1b0] sm:$0xff]  ;;  %v147_v42 = vld [vmem:[#allocation4 + $0x1a8] sm:$0xff]  ;;  %v114_v45 = vld [vmem:[#allocation4 + $0xa0] sm:$0xff] }
  0x37   :  { %1864 = vmatpush3.msra.mxu1 %v136_v24  ;;  %1809 = vmatprep.subr.mxu0 %v119_v25  ;;  %v100_v39 = vld [vmem:[#allocation4 + $0x30] sm:$0xff]  ;;  %v99_v43 = vld [vmem:[#allocation4 + $0x28] sm:$0xff]  ;;  %v146_v46 = vld [vmem:[#allocation4 + $0x1a0] sm:$0xff] }
  0x38   :  { %1865 = vmatprep.subr.mxu1 %v151_v26  ;;  %1810 = vmatpush3.msra.mxu0 %v103_v27  ;;  %v132_v40 = vld [vmem:[#allocation4 + $0x130] sm:$0xff]  ;;  %v131_v44 = vld [vmem:[#allocation4 + $0x128] sm:$0xff]  ;;  %v98_v47 = vld [vmem:[#allocation4 + $0x20] sm:$0xff] }
  0x39   :  { %1866 = vmatpush3.msra.mxu1 %v135_v28  ;;  %1811 = vmatprep.subr.mxu0 %v118_v29  ;;  %v130_v48 = vld [vmem:[#allocation4 + $0x120] sm:$0xff]  ;;  %v113_v49 = vld [vmem:[#allocation4 + $0x98] sm:$0xff]  ;;  %v112_v53 = vld [vmem:[#allocation4 + $0x90] sm:$0xff] }
  0x3a   :  { %1867 = vmatprep.subr.mxu1 %v150_v30  ;;  %1812 = vmatpush3.msra.mxu0 %v102_v31  ;;  %v145_v50 = vld [vmem:[#allocation4 + $0x198] sm:$0xff]  ;;  %v144_v54 = vld [vmem:[#allocation4 + $0x190] sm:$0xff]  ;;  %v111_v57 = vld [vmem:[#allocation4 + $0x88] sm:$0xff] }
  0x3b   :  { %1868 = vmatpush3.msra.mxu1 %v134_v32  ;;  %1813 = vmatprep.subr.mxu0 %v117_v33  ;;  %v97_v51 = vld [vmem:[#allocation4 + $0x18] sm:$0xff]  ;;  %v96_v55 = vld [vmem:[#allocation4 + $0x10] sm:$0xff]  ;;  %v143_v58 = vld [vmem:[#allocation4 + $0x188] sm:$0xff] }
  0x3c   :  { %1869 = vmatprep.subr.mxu1 %v149_v34  ;;  %1814 = vmatpush3.msra.mxu0 %v101_v35  ;;  %v129_v52 = vld [vmem:[#allocation4 + $0x118] sm:$0xff]  ;;  %v128_v56 = vld [vmem:[#allocation4 + $0x110] sm:$0xff]  ;;  %v95_v59 = vld [vmem:[#allocation4 + $0x8] sm:$0xff] }
  0x3d   :  { %1870 = vmatpush3.msra.mxu1 %v133_v36  ;;  %1815 = vmatprep.subr.mxu0 %v116_v37  ;;  %v127_v60 = vld [vmem:[#allocation4 + $0x108] sm:$0xff]  ;;  %v110_v61 = vld [vmem:[#allocation4 + $0x80] sm:$0xff]  ;;  %v65_v2 = vld [vmem:[#allocation7 + $0x18] sm:$0xff] }
  0x3e   :  { %1871 = vmatprep.subr.mxu1 %v148_v38  ;;  %1816 = vmatpush3.msra.mxu0 %v100_v39  ;;  %v142_v62 = vld [vmem:[#allocation4 + $0x180] sm:$0xff]  ;;  %v63_v0 = vld [vmem:[#allocation7 + $0x8] sm:$0xff]  ;;  %v64_v4 = vld [vmem:[#allocation7 + $0x10] sm:$0xff] }
  0x3f   :  { %1872 = vmatpush3.msra.mxu1 %v132_v40  ;;  %1817 = vmatprep.subr.mxu0 %v115_v41  ;;  %v94_v63 = vld [vmem:[#allocation4] sm:$0xff]  ;;  %v67_v5 = vld [vmem:[#allocation7 + $0x28] sm:$0xff]  ;;  %v69_v6 = vld [vmem:[#allocation7 + $0x38] sm:$0xff] }
  0x40   :  { %1873 = vmatprep.subr.mxu1 %v147_v42  ;;  %1818 = vmatpush3.msra.mxu0 %v99_v43  ;;  %v126_v1 = vld [vmem:[#allocation4 + $0x100] sm:$0xff]  ;;  %v163_v7 = vld [vmem:[%s3228_s2 + $0x28] sm:$0xff]  ;;  %v165_v8 = vld [vmem:[%s3228_s2 + $0x38] sm:$0xff] }
  0x41   :  { %1874 = vmatpush3.msra.mxu1 %v131_v44  ;;  %1819 = vmatprep.subr.mxu0 %v114_v45  ;;  %v62_v3 = vld [vmem:[#allocation7] sm:$0xff]  ;;  %v68_v10 = vld [vmem:[#allocation7 + $0x30] sm:$0xff]  ;;  %v71_v11 = vld [vmem:[#allocation7 + $0x48] sm:$0xff] }
  0x42   :  { %1875 = vmatprep.subr.mxu1 %v146_v46  ;;  %1820 = vmatpush3.msra.mxu0 %v98_v47  ;;  %v66_v9 = vld [vmem:[#allocation7 + $0x20] sm:$0xff]  ;;  %v73_v12 = vld [vmem:[#allocation7 + $0x58] sm:$0xff]  ;;  %v164_v14 = vld [vmem:[%s3228_s2 + $0x30] sm:$0xff] }
  0x43   :  { %1876 = vmatpush3.msra.mxu1 %v130_v48  ;;  %1821 = vmatprep.subr.mxu0 %v113_v49  ;;  %v162_v13 = vld [vmem:[%s3228_s2 + $0x20] sm:$0xff]  ;;  %v72_v16 = vld [vmem:[#allocation7 + $0x50] sm:$0xff]  ;;  %v75_v17 = vld [vmem:[#allocation7 + $0x68] sm:$0xff] }
  0x44   :  { %1877 = vmatprep.subr.mxu1 %v145_v50  ;;  %1822 = vmatpush3.msra.mxu0 %v97_v51  ;;  %v70_v15 = vld [vmem:[#allocation7 + $0x40] sm:$0xff]  ;;  %v77_v18 = vld [vmem:[#allocation7 + $0x78] sm:$0xff]  ;;  %v160_v19 = vld [vmem:[%s3228_s2 + $0x10] sm:$0xff] }
  0x45   :  { %1878 = vmatpush3.msra.mxu1 %v129_v52  ;;  %1823 = vmatprep.subr.mxu0 %v112_v53  ;;  %v161_v20 = vld [vmem:[%s3228_s2 + $0x18] sm:$0xff]  ;;  %v74_v21 = vld [vmem:[#allocation7 + $0x60] sm:$0xff]  ;;  %v76_v22 = vld [vmem:[#allocation7 + $0x70] sm:$0xff] }
  0x46   :  { %1879 = vmatprep.subr.mxu1 %v144_v54  ;;  %1824 = vmatpush3.msra.mxu0 %v96_v55  ;;  %v79_v23 = vld [vmem:[#allocation7 + $0x88] sm:$0xff]  ;;  %v81_v24 = vld [vmem:[#allocation7 + $0x98] sm:$0xff]  ;;  %v158_v25 = vld [vmem:[%s3228_s2] sm:$0xff] }
  0x47   :  { %1880 = vmatpush3.msra.mxu1 %v128_v56  ;;  %1825 = vmatprep.subr.mxu0 %v111_v57  ;;  %v159_v26 = vld [vmem:[%s3228_s2 + $0x8] sm:$0xff]  ;;  %v78_v27 = vld [vmem:[#allocation7 + $0x80] sm:$0xff]  ;;  %v80_v28 = vld [vmem:[#allocation7 + $0x90] sm:$0xff]  ;;  %s2205_s2 = smov 4  }
  0x48   :  { %1881 = vmatprep.subr.mxu1 %v143_v58  ;;  %1826 = vmatpush3.msra.mxu0 %v95_v59  ;;  %v83_v29 = vld [vmem:[#allocation7 + $0xa8] sm:$0xff]  ;;  %v85_v30 = vld [vmem:[#allocation7 + $0xb8] sm:$0xff]  ;;  %v82_v31 = vld [vmem:[#allocation7 + $0xa0] sm:$0xff] }
  0x49   :  { %1882 = vmatpush3.msra.mxu1 %v127_v60  ;;  %1827 = vmatprep.subr.mxu0 %v110_v61  ;;  %v84_v32 = vld [vmem:[#allocation7 + $0xb0] sm:$0xff]  ;;  %v87_v33 = vld [vmem:[#allocation7 + $0xc8] sm:$0xff]  ;;  %v89_v34 = vld [vmem:[#allocation7 + $0xd8] sm:$0xff] }
  0x4a   :  { %1883 = vmatprep.subr.mxu1 %v142_v62  ;;  %1828 = vmatpush3.msra.mxu0 %v94_v63  ;;  %v86_v35 = vld [vmem:[#allocation7 + $0xc0] sm:$0xff]  ;;  %v88_v36 = vld [vmem:[#allocation7 + $0xd0] sm:$0xff]  ;;  %v91_v37 = vld [vmem:[#allocation7 + $0xe8] sm:$0xff] }
  0x4b   :  { %270 = vmatprep.mubr.f32.mxu0 %v63_v0  ;;  %1884 = vmatpush3.msra.mxu1 %v126_v1  ;;  %v93_v38 = vld [vmem:[#allocation7 + $0xf8] sm:$0xff]  ;;  %v90_v39 = vld [vmem:[#allocation7 + $0xe0] sm:$0xff]  ;;  %v92_v40 = vld [vmem:[#allocation7 + $0xf0] sm:$0xff] }
  0x4c   :  { %375 = vmatprep.mubr.f32.mxu1 %v65_v2  ;;  %271 = vmatmul.mubr.f32.vlgmr.msra.gmra.mxu0 %v62_v3 }
  0x4d   :  { %376 = vmatmul.mubr.f32.vlgmr.msra.gmra.mxu1 %v64_v4  ;;  %275 = vmatprep.mubr.f32.mxu0 %v67_v5 }
  0x4e   :  { %380 = vmatprep.mubr.f32.mxu1 %v69_v6  ;;  %193 = vperm.xlu1 %2108, %v163_v7  }
  0x4f   :  { %203 = vperm.xlu0 %2107, %v165_v8  }
  0x50   :  { %276 = vmatmul.mubr.f32.gmra.mxu0 %v66_v9 }
  0x51   :  { %381 = vmatmul.mubr.f32.gmra.mxu1 %v68_v10  ;;  %280 = vmatprep.mubr.f32.mxu0 %v71_v11 }
  0x52   :  { %385 = vmatprep.mubr.f32.mxu1 %v73_v12  ;;  %188 = vperm.xlu1 %2108, %v162_v13  }
  0x53   :  { %198 = vperm.xlu0 %2107, %v164_v14  }
  0x54   :  { %281 = vmatmul.mubr.f32.gmra.mxu0 %v70_v15 }
  0x55   :  { %386 = vmatmul.mubr.f32.gmra.mxu1 %v72_v16  ;;  %285 = vmatprep.mubr.f32.mxu0 %v75_v17 }
  0x56   :  { %390 = vmatprep.mubr.f32.mxu1 %v77_v18  ;;  %178 = vperm.xlu1 %2108, %v160_v19  }
  0x57   :  { %183 = vperm.xlu0 %2107, %v161_v20  }
  0x58   :  { %286 = vmatmul.mubr.f32.gmra.mxu0 %v74_v21 }
  0x59   :  { %391 = vmatmul.mubr.f32.gmra.mxu1 %v76_v22  ;;  %290 = vmatprep.mubr.f32.mxu0 %v79_v23 }
  0x5a   :  { %395 = vmatprep.mubr.f32.mxu1 %v81_v24  ;;  %168 = vperm.xlu1 %2108, %v158_v25  }
  0x5b   :  { %173 = vperm.xlu0 %2107, %v159_v26  }
  0x5c   :  { %291 = vmatmul.mubr.f32.gmra.mxu0 %v78_v27 }
  0x5d   :  { %396 = vmatmul.mubr.f32.gmra.mxu1 %v80_v28  ;;  %295 = vmatprep.mubr.f32.mxu0 %v83_v29 }
  0x5e   :  { %400 = vmatprep.mubr.f32.mxu1 %v85_v30 }
  0x60   :  { %296 = vmatmul.mubr.f32.gmra.mxu0 %v82_v31 }
  0x61   :  { %401 = vmatmul.mubr.f32.gmra.mxu1 %v84_v32  ;;  %300 = vmatprep.mubr.f32.mxu0 %v87_v33 }
  0x62   :  { %405 = vmatprep.mubr.f32.mxu1 %v89_v34 }
  0x64   :  { %301 = vmatmul.mubr.f32.gmra.mxu0 %v86_v35 }
  0x65   :  { %406 = vmatmul.mubr.f32.gmra.mxu1 %v88_v36  ;;  %305 = vmatprep.mubr.f32.mxu0 %v91_v37 }
  0x66   :  { %410 = vmatprep.mubr.f32.mxu1 %v93_v38 }
  0x68   :  { %306 = vmatmul.mubr.f32.gmra.mxu0 %v90_v39 }
  0x69   :  { %411 = vmatmul.mubr.f32.gmra.mxu1 %v92_v40 }
  0xc9   :  { %v194_v41 = vpop.permute.xlu1 %193 }
  0xca   :  { %v2281_v42 = vpop.permute.xlu0 %203 }
  0xcd   :  { %v189_v43 = vpop.permute.xlu1 %188 }
  0xce   :  { %v2283_v44 = vpop.permute.xlu0 %198 }
  0xd1   :  { %v179_v45 = vpop.permute.xlu1 %178 }
  0xd2   :  { %v184_v46 = vpop.permute.xlu0 %183 }
  0xd5   :  { %v169_v51 = vpop.permute.xlu1 %168 }
  0xd6   :  { %v174_v57 = vpop.permute.xlu0 %173 }
 0x10c   :  { %v1829_v47 = vpop.f32.mrf.mxu0 }
 0x10d   :  { %v1885_v48 = vpop.f32.mrf.mxu1 }
 0x10e   :  { %v1830_v49 = vpop.f32.mrf.mxu0 }
 0x10f   :  { %v1886_v50 = vpop.f32.mrf.mxu1  ;;  %v1831_v52 = vadd.f32 %v1830_v49, %v1829_v47 }
 0x110   :  { %v1832_v53 = vpop.f32.mrf.mxu0  ;;  %v1887_v56 = vadd.f32 %v1886_v50, %v1885_v48 }
 0x111   :  { %v1888_v54 = vpop.f32.mrf.mxu1  ;;  %v273_v55 = vadd.f32 %v1831_v52, %v169_v51 }
 0x112   :  { %v1833_v58 = vpop.f32.mrf.mxu0 }
 0x113   :  { %v1889_v59 = vpop.f32.mrf.mxu1  ;;  %v2285_v60 = vadd.f32 %v1887_v56, %v273_v55  ;;  %v1834_v61 = vadd.f32 %v1833_v58, %v1832_v53 }
 0x114   :  { %v1890_v62 = vadd.f32 %v1889_v59, %v1888_v54  ;;  %v1835_v63 = vpop.f32.mrf.mxu0 }
 0x115   :  { %3246 = vst [vmem:[#allocation14_spill] sm:$0xff] %v2285_v60  ;;  %v1891_v0 = vpop.f32.mrf.mxu1  ;;  %424 = vrot.lane.b32.xlu1 %v2285_v60, %s2205_s2  ;;  %v278_v1 = vadd.f32 %v1834_v61, %v174_v57 }
 0x116   :  { %v1836_v2 = vpop.f32.mrf.mxu0 }
 0x117   :  { %v1892_v3 = vpop.f32.mrf.mxu1  ;;  %v1837_v4 = vadd.f32 %v1836_v2, %v1835_v63  ;;  %v2289_v5 = vadd.f32 %v1890_v62, %v278_v1 }
 0x118   :  { %v1893_v6 = vadd.f32 %v1892_v3, %v1891_v0  ;;  %v1838_v7 = vpop.f32.mrf.mxu0 }
 0x119   :  { %3247 = vst [vmem:[#allocation15_spill] sm:$0xff] %v2289_v5  ;;  %v1894_v8 = vpop.f32.mrf.mxu1  ;;  %v283_v9 = vadd.f32 %v1837_v4, %v179_v45  ;;  %426 = vrot.lane.b32.xlu0 %v2289_v5, %s2205_s2 }
 0x11a   :  { %v1839_v10 = vpop.f32.mrf.mxu0 }
 0x11b   :  { %v1895_v11 = vpop.f32.mrf.mxu1  ;;  %v2293_v12 = vadd.f32 %v1893_v6, %v283_v9  ;;  %v1840_v13 = vadd.f32 %v1839_v10, %v1838_v7 }
 0x11c   :  { %v1896_v14 = vadd.f32 %v1895_v11, %v1894_v8  ;;  %v1841_v15 = vpop.f32.mrf.mxu0 }
 0x11d   :  { %3248 = vst [vmem:[#allocation16_spill] sm:$0xff] %v2293_v12  ;;  %v1897_v16 = vpop.f32.mrf.mxu1  ;;  %v288_v17 = vadd.f32 %v1840_v13, %v184_v46  ;;  %428 = vrot.lane.b32.xlu1 %v2293_v12, %s2205_s2 }
 0x11e   :  { %v1842_v18 = vpop.f32.mrf.mxu0 }
 0x11f   :  { %v1898_v19 = vpop.f32.mrf.mxu1  ;;  %v2297_v20 = vadd.f32 %v1896_v14, %v288_v17  ;;  %v1843_v21 = vadd.f32 %v1842_v18, %v1841_v15 }
 0x120   :  { %v1899_v22 = vadd.f32 %v1898_v19, %v1897_v16  ;;  %v1844_v23 = vpop.f32.mrf.mxu0 }
 0x121   :  { %3249 = vst [vmem:[#allocation17_spill] sm:$0xff] %v2297_v20  ;;  %v1900_v24 = vpop.f32.mrf.mxu1  ;;  %v293_v25 = vadd.f32 %v1843_v21, %v189_v43  ;;  %430 = vrot.lane.b32.xlu0 %v2297_v20, %s2205_s2 }
 0x122   :  { %v1845_v26 = vpop.f32.mrf.mxu0 }
 0x123   :  { %v1901_v27 = vpop.f32.mrf.mxu1  ;;  %v2301_v28 = vadd.f32 %v1899_v22, %v293_v25  ;;  %v1846_v29 = vadd.f32 %v1845_v26, %v1844_v23 }
 0x124   :  { %v1902_v30 = vadd.f32 %v1901_v27, %v1900_v24  ;;  %v1847_v31 = vpop.f32.mrf.mxu0 }
 0x125   :  { %3250 = vst [vmem:[#allocation18_spill] sm:$0xff] %v2301_v28  ;;  %v1903_v32 = vpop.f32.mrf.mxu1  ;;  %v298_v33 = vadd.f32 %v1846_v29, %v194_v41  ;;  %432 = vrot.lane.b32.xlu1 %v2301_v28, %s2205_s2 }
 0x126   :  { %v1848_v34 = vpop.f32.mrf.mxu0 }
 0x127   :  { %v1904_v35 = vpop.f32.mrf.mxu1  ;;  %v2305_v36 = vadd.f32 %v1902_v30, %v298_v33  ;;  %v1849_v37 = vadd.f32 %v1848_v34, %v1847_v31 }
 0x128   :  { %v1905_v38 = vadd.f32 %v1904_v35, %v1903_v32  ;;  %v1850_v39 = vpop.f32.mrf.mxu0 }
 0x129   :  { %3251 = vst [vmem:[#allocation19_spill] sm:$0xff] %v2305_v36  ;;  %v1906_v40 = vpop.f32.mrf.mxu1  ;;  %v303_v43 = vadd.f32 %v1849_v37, %v2283_v44  ;;  %434 = vrot.lane.b32.xlu0 %v2305_v36, %s2205_s2 }
 0x12a   :  { %v1851_v45 = vpop.f32.mrf.mxu0 }
 0x12b   :  { %v1907_v46 = vpop.f32.mrf.mxu1  ;;  %v2310_v47 = vadd.f32 %v1905_v38, %v303_v43  ;;  %v1852_v41 = vadd.f32 %v1851_v45, %v1850_v39 }
 0x12c   :  { %v1908_v48 = vadd.f32 %v1907_v46, %v1906_v40 }
 0x12d   :  { %3252 = vst [vmem:[#allocation20_spill] sm:$0xff] %v2310_v47  ;;  %v308_v49 = vadd.f32 %v1852_v41, %v2281_v42  ;;  %436 = vrot.lane.b32.xlu1 %v2310_v47, %s2205_s2 }
 0x12f   :  { %v2315_v50 = vadd.f32 %v1908_v48, %v308_v49 }
 0x131   :  { %3253 = vst [vmem:[#allocation21_spill] sm:$0xff] %v2315_v50  ;;  %438 = vrot.lane.b32.xlu0 %v2315_v50, %s2205_s2 }
 0x187   :  { %v425_v44 = vpop.permute.xlu1 %424 }
 0x188   :  { %449 = vst.msk [vmem:[#allocation2] sm:$0xff] %vm448_vm0, %v425_v44 }
 0x189   :  { %451 = vst.msk [vmem:[#allocation2 + $0x8] sm:$0xff] %vm450_vm1, %v425_v44 }
 0x18b   :  { %v427_v51 = vpop.permute.xlu0 %426 }
 0x18c   :  { %452 = vst.msk [vmem:[#allocation2 + $0x10] sm:$0xff] %vm448_vm0, %v427_v51 }
 0x18d   :  { %453 = vst.msk [vmem:[#allocation2 + $0x18] sm:$0xff] %vm450_vm1, %v427_v51 }
 0x18f   :  { %v429_v42 = vpop.permute.xlu1 %428  ;;  %v2325_v53 = vld [vmem:[#allocation2] sm:$0xff] }
 0x190   :  { %v2323_v52 = vld [vmem:[#allocation2 + $0x8] sm:$0xff]  ;;  %454 = vst.msk [vmem:[#allocation2 + $0x20] sm:$0xff] %vm448_vm0, %v429_v42  ;;  %746 = vrot.lane.b32.xlu0 %v2325_v53, %s2206_s27 }
 0x191   :  { %455 = vst.msk [vmem:[#allocation2 + $0x28] sm:$0xff] %vm450_vm1, %v429_v42  ;;  %748 = vrot.lane.b32.xlu1 %v2323_v52, %s2206_s27 }
 0x193   :  { %v431_v54 = vpop.permute.xlu0 %430  ;;  %v2365_v61 = vld [vmem:[#allocation2 + $0x10] sm:$0xff] }
 0x194   :  { %456 = vst.msk [vmem:[#allocation2 + $0x30] sm:$0xff] %vm448_vm0, %v431_v54  ;;  %1057 = vrot.lane.b32.xlu0 %v2325_v53, %s2207_s30  ;;  %v2363_v59 = vld [vmem:[#allocation2 + $0x18] sm:$0xff]  ;;  %3254 = vst [vmem:[#allocation22_spill] sm:$0xff] %v2365_v61 }
 0x195   :  { %457 = vst.msk [vmem:[#allocation2 + $0x38] sm:$0xff] %vm450_vm1, %v431_v54  ;;  %1059 = vrot.lane.b32.xlu1 %v2323_v52, %s2207_s30 }
 0x197   :  { %v433_v55 = vpop.permute.xlu1 %432  ;;  %v2393_v63 = vld [vmem:[#allocation2 + $0x20] sm:$0xff] }
 0x198   :  { %458 = vst.msk [vmem:[#allocation2 + $0x40] sm:$0xff] %vm448_vm0, %v433_v55  ;;  %544 = vrot.lane.b32.xlu0 %v2325_v53, %s2208_s6  ;;  %v2391_v62 = vld [vmem:[#allocation2 + $0x28] sm:$0xff]  ;;  %3255 = vst [vmem:[#allocation23_spill] sm:$0xff] %v2393_v63 }
 0x199   :  { %459 = vst.msk [vmem:[#allocation2 + $0x48] sm:$0xff] %vm450_vm1, %v433_v55  ;;  %546 = vrot.lane.b32.xlu1 %v2323_v52, %s2208_s6 }
 0x19b   :  { %v435_v56 = vpop.permute.xlu0 %434  ;;  %v2421_v1 = vld [vmem:[#allocation2 + $0x30] sm:$0xff] }
 0x19c   :  { %460 = vst.msk [vmem:[#allocation2 + $0x50] sm:$0xff] %vm448_vm0, %v435_v56  ;;  %855 = vrot.lane.b32.xlu0 %v2325_v53, %s2209_s1  ;;  %v2419_v0 = vld [vmem:[#allocation2 + $0x38] sm:$0xff]  ;;  %3256 = vst [vmem:[#allocation24_spill] sm:$0xff] %v2421_v1 }
 0x19d   :  { %461 = vst.msk [vmem:[#allocation2 + $0x58] sm:$0xff] %vm450_vm1, %v435_v56  ;;  %857 = vrot.lane.b32.xlu1 %v2323_v52, %s2209_s1 }
 0x19f   :  { %v437_v57 = vpop.permute.xlu1 %436  ;;  %v2449_v3 = vld [vmem:[#allocation2 + $0x40] sm:$0xff] }
 0x1a0   :  { %462 = vst.msk [vmem:[#allocation2 + $0x60] sm:$0xff] %vm448_vm0, %v437_v57  ;;  %645 = vrot.lane.b32.xlu0 %v2325_v53, %s2210_s7  ;;  %v2447_v2 = vld [vmem:[#allocation2 + $0x48] sm:$0xff]  ;;  %3257 = vst [vmem:[#allocation25_spill] sm:$0xff] %v2449_v3 }
 0x1a1   :  { %463 = vst.msk [vmem:[#allocation2 + $0x68] sm:$0xff] %vm450_vm1, %v437_v57  ;;  %647 = vrot.lane.b32.xlu1 %v2323_v52, %s2210_s7 }
 0x1a3   :  { %v439_v58 = vpop.permute.xlu0 %438  ;;  %v2485_v10 = vld [vmem:[#allocation2 + $0x50] sm:$0xff] }
 0x1a4   :  { %464 = vst.msk [vmem:[#allocation2 + $0x70] sm:$0xff] %vm448_vm0, %v439_v58  ;;  %956 = vrot.lane.b32.xlu0 %v2325_v53, %s2211_s8  ;;  %v2483_v9 = vld [vmem:[#allocation2 + $0x58] sm:$0xff]  ;;  %3258 = vst [vmem:[#allocation26_spill] sm:$0xff] %v2485_v10 }
 0x1a5   :  { %465 = vst.msk [vmem:[#allocation2 + $0x78] sm:$0xff] %vm450_vm1, %v439_v58  ;;  %958 = vrot.lane.b32.xlu1 %v2323_v52, %s2211_s8  ;;  %vm1190_vm1 = vcmask 982016  }
 0x1a7   :  { %v2545_v29 = vld [vmem:[#allocation2 + $0x60] sm:$0xff] }
 0x1a8   :  { %750 = vrot.lane.b32.xlu0 %v2365_v61, %s2206_s27  ;;  %v2543_v27 = vld [vmem:[#allocation2 + $0x68] sm:$0xff] }
 0x1a9   :  { %752 = vrot.lane.b32.xlu1 %v2363_v59, %s2206_s27 }
 0x1ab   :  { %v2605_v49 = vld [vmem:[#allocation2 + $0x70] sm:$0xff] }
 0x1ac   :  { %1061 = vrot.lane.b32.xlu0 %v2365_v61, %s2207_s30  ;;  %v2603_v48 = vld [vmem:[#allocation2 + $0x78] sm:$0xff] }
 0x1ad   :  { %1063 = vrot.lane.b32.xlu1 %v2363_v59, %s2207_s30 }
 0x1b0   :  { %548 = vrot.lane.b32.xlu0 %v2365_v61, %s2208_s6 }
 0x1b1   :  { %550 = vrot.lane.b32.xlu1 %v2363_v59, %s2208_s6 }
 0x1b4   :  { %859 = vrot.lane.b32.xlu0 %v2365_v61, %s2209_s1 }
 0x1b5   :  { %861 = vrot.lane.b32.xlu1 %v2363_v59, %s2209_s1 }
 0x1b8   :  { %649 = vrot.lane.b32.xlu0 %v2365_v61, %s2210_s7 }
 0x1b9   :  { %651 = vrot.lane.b32.xlu1 %v2363_v59, %s2210_s7 }
 0x1bc   :  { %960 = vrot.lane.b32.xlu0 %v2365_v61, %s2211_s8 }
 0x1bd   :  { %962 = vrot.lane.b32.xlu1 %v2363_v59, %s2211_s8 }
 0x1c0   :  { %754 = vrot.lane.b32.xlu0 %v2393_v63, %s2206_s27 }
 0x1c1   :  { %756 = vrot.lane.b32.xlu1 %v2391_v62, %s2206_s27 }
 0x1c4   :  { %1065 = vrot.lane.b32.xlu0 %v2393_v63, %s2207_s30 }
 0x1c5   :  { %1067 = vrot.lane.b32.xlu1 %v2391_v62, %s2207_s30 }
 0x1c8   :  { %552 = vrot.lane.b32.xlu0 %v2393_v63, %s2208_s6 }
 0x1c9   :  { %554 = vrot.lane.b32.xlu1 %v2391_v62, %s2208_s6 }
 0x1cc   :  { %863 = vrot.lane.b32.xlu0 %v2393_v63, %s2209_s1 }
 0x1cd   :  { %865 = vrot.lane.b32.xlu1 %v2391_v62, %s2209_s1 }
 0x1d0   :  { %653 = vrot.lane.b32.xlu0 %v2393_v63, %s2210_s7 }
 0x1d1   :  { %655 = vrot.lane.b32.xlu1 %v2391_v62, %s2210_s7 }
 0x1d4   :  { %964 = vrot.lane.b32.xlu0 %v2393_v63, %s2211_s8 }
 0x1d5   :  { %966 = vrot.lane.b32.xlu1 %v2391_v62, %s2211_s8 }
 0x1d8   :  { %758 = vrot.lane.b32.xlu0 %v2421_v1, %s2206_s27 }
 0x1d9   :  { %760 = vrot.lane.b32.xlu1 %v2419_v0, %s2206_s27 }
 0x1dc   :  { %1069 = vrot.lane.b32.xlu0 %v2421_v1, %s2207_s30 }
 0x1dd   :  { %1071 = vrot.lane.b32.xlu1 %v2419_v0, %s2207_s30 }
 0x1e0   :  { %556 = vrot.lane.b32.xlu0 %v2421_v1, %s2208_s6 }
 0x1e1   :  { %558 = vrot.lane.b32.xlu1 %v2419_v0, %s2208_s6 }
 0x1e4   :  { %867 = vrot.lane.b32.xlu0 %v2421_v1, %s2209_s1 }
 0x1e5   :  { %869 = vrot.lane.b32.xlu1 %v2419_v0, %s2209_s1 }
 0x1e8   :  { %657 = vrot.lane.b32.xlu0 %v2421_v1, %s2210_s7 }
 0x1e9   :  { %659 = vrot.lane.b32.xlu1 %v2419_v0, %s2210_s7 }
 0x1ec   :  { %968 = vrot.lane.b32.xlu0 %v2421_v1, %s2211_s8 }
 0x1ed   :  { %970 = vrot.lane.b32.xlu1 %v2419_v0, %s2211_s8 }
 0x1f0   :  { %762 = vrot.lane.b32.xlu0 %v2449_v3, %s2206_s27 }
 0x1f1   :  { %764 = vrot.lane.b32.xlu1 %v2447_v2, %s2206_s27 }
 0x1f4   :  { %1073 = vrot.lane.b32.xlu0 %v2449_v3, %s2207_s30 }
 0x1f5   :  { %1075 = vrot.lane.b32.xlu1 %v2447_v2, %s2207_s30 }
 0x1f8   :  { %560 = vrot.lane.b32.xlu0 %v2449_v3, %s2208_s6 }
 0x1f9   :  { %562 = vrot.lane.b32.xlu1 %v2447_v2, %s2208_s6 }
 0x1fc   :  { %871 = vrot.lane.b32.xlu0 %v2449_v3, %s2209_s1 }
 0x1fd   :  { %873 = vrot.lane.b32.xlu1 %v2447_v2, %s2209_s1 }
 0x200   :  { %661 = vrot.lane.b32.xlu0 %v2449_v3, %s2210_s7 }
 0x201   :  { %663 = vrot.lane.b32.xlu1 %v2447_v2, %s2210_s7 }
 0x202   :  { %v2471_v4 = vpop.permute.xlu0 %746 }
 0x203   :  { %v2473_v6 = vpop.permute.xlu1 %748 }
 0x204   :  { %972 = vrot.lane.b32.xlu0 %v2449_v3, %s2211_s8 }
 0x205   :  { %974 = vrot.lane.b32.xlu1 %v2447_v2, %s2211_s8 }
 0x206   :  { %v2479_v7 = vpop.permute.xlu0 %1057 }
 0x207   :  { %v2481_v8 = vpop.permute.xlu1 %1059 }
 0x208   :  { %766 = vrot.lane.b32.xlu0 %v2485_v10, %s2206_s27 }
 0x209   :  { %768 = vrot.lane.b32.xlu1 %v2483_v9, %s2206_s27 }
 0x20a   :  { %v2491_v11 = vpop.permute.xlu0 %544 }
 0x20b   :  { %v2493_v13 = vpop.permute.xlu1 %546 }
 0x20c   :  { %1077 = vrot.lane.b32.xlu0 %v2485_v10, %s2207_s30 }
 0x20d   :  { %1079 = vrot.lane.b32.xlu1 %v2483_v9, %s2207_s30 }
 0x20e   :  { %v2499_v14 = vpop.permute.xlu0 %855 }
 0x20f   :  { %v2501_v15 = vpop.permute.xlu1 %857 }
 0x210   :  { %564 = vrot.lane.b32.xlu0 %v2485_v10, %s2208_s6 }
 0x211   :  { %566 = vrot.lane.b32.xlu1 %v2483_v9, %s2208_s6 }
 0x212   :  { %v2507_v16 = vpop.permute.xlu0 %645 }
 0x213   :  { %3259 = vst [vmem:[#allocation27_spill] sm:$0xff] %v2507_v16  ;;  %v2509_v17 = vpop.permute.xlu1 %647 }
 0x214   :  { %3260 = vst [vmem:[#allocation28_spill] sm:$0xff] %v2509_v17  ;;  %875 = vrot.lane.b32.xlu0 %v2485_v10, %s2209_s1 }
 0x215   :  { %877 = vrot.lane.b32.xlu1 %v2483_v9, %s2209_s1 }
 0x216   :  { %v2515_v18 = vpop.permute.xlu0 %956 }
 0x217   :  { %3261 = vst [vmem:[#allocation29_spill] sm:$0xff] %v2515_v18  ;;  %v2517_v19 = vpop.permute.xlu1 %958 }
 0x218   :  { %3262 = vst [vmem:[#allocation30_spill] sm:$0xff] %v2517_v19  ;;  %665 = vrot.lane.b32.xlu0 %v2485_v10, %s2210_s7  ;;  %v1325_v19 = vld [vmem:[#allocation9 + $0x8] sm:$0xff] }
 0x219   :  { %667 = vrot.lane.b32.xlu1 %v2483_v9, %s2210_s7  ;;  %1512 = vmatprep.mubr.f32.mxu0 %v1325_v19 }
 0x21a   :  { %v2523_v21 = vpop.permute.xlu0 %750 }
 0x21b   :  { %v2525_v22 = vpop.permute.xlu1 %752 }
 0x21c   :  { %976 = vrot.lane.b32.xlu0 %v2485_v10, %s2211_s8 }
 0x21d   :  { %978 = vrot.lane.b32.xlu1 %v2483_v9, %s2211_s8 }
 0x21e   :  { %v2531_v23 = vpop.permute.xlu0 %1061 }
 0x21f   :  { %v2533_v24 = vpop.permute.xlu1 %1063 }
 0x220   :  { %1279 = vrot.lane.b32.xlu0 %v2485_v10, %s2212_s9 }
 0x221   :  { %1281 = vrot.lane.b32.xlu1 %v2483_v9, %s2212_s9 }
 0x222   :  { %v2539_v25 = vpop.permute.xlu0 %548 }
 0x223   :  { %v2541_v26 = vpop.permute.xlu1 %550 }
 0x224   :  { %770 = vrot.lane.b32.xlu0 %v2545_v29, %s2206_s27 }
 0x225   :  { %772 = vrot.lane.b32.xlu1 %v2543_v27, %s2206_s27 }
 0x226   :  { %v2551_v30 = vpop.permute.xlu0 %859 }
 0x227   :  { %v2553_v31 = vpop.permute.xlu1 %861 }
 0x228   :  { %1081 = vrot.lane.b32.xlu0 %v2545_v29, %s2207_s30 }
 0x229   :  { %1083 = vrot.lane.b32.xlu1 %v2543_v27, %s2207_s30 }
 0x22a   :  { %v2559_v32 = vpop.permute.xlu0 %649 }
 0x22b   :  { %3263 = vst [vmem:[#allocation31_spill] sm:$0xff] %v2559_v32  ;;  %v2561_v33 = vpop.permute.xlu1 %651 }
 0x22c   :  { %3264 = vst [vmem:[#allocation32_spill] sm:$0xff] %v2561_v33  ;;  %568 = vrot.lane.b32.xlu0 %v2545_v29, %s2208_s6 }
 0x22d   :  { %570 = vrot.lane.b32.xlu1 %v2543_v27, %s2208_s6 }
 0x22e   :  { %v2567_v34 = vpop.permute.xlu0 %960 }
 0x22f   :  { %3265 = vst [vmem:[#allocation33_spill] sm:$0xff] %v2567_v34  ;;  %v2569_v35 = vpop.permute.xlu1 %962  ;;  %v1327_v34 = vld [vmem:[#allocation9 + $0x18] sm:$0xff] }
 0x230   :  { %3266 = vst [vmem:[#allocation34_spill] sm:$0xff] %v2569_v35  ;;  %879 = vrot.lane.b32.xlu0 %v2545_v29, %s2209_s1  ;;  %1597 = vmatprep.mubr.f32.mxu1 %v1327_v34 }
 0x231   :  { %881 = vrot.lane.b32.xlu1 %v2543_v27, %s2209_s1 }
 0x232   :  { %v2575_v37 = vpop.permute.xlu0 %754 }
 0x233   :  { %v2577_v38 = vpop.permute.xlu1 %756 }
 0x234   :  { %669 = vrot.lane.b32.xlu0 %v2545_v29, %s2210_s7 }
 0x235   :  { %671 = vrot.lane.b32.xlu1 %v2543_v27, %s2210_s7 }
 0x236   :  { %v2583_v39 = vpop.permute.xlu0 %1065 }
 0x237   :  { %v2585_v40 = vpop.permute.xlu1 %1067 }
 0x238   :  { %980 = vrot.lane.b32.xlu0 %v2545_v29, %s2211_s8 }
 0x239   :  { %982 = vrot.lane.b32.xlu1 %v2543_v27, %s2211_s8 }
 0x23a   :  { %v2591_v43 = vpop.permute.xlu0 %552 }
 0x23b   :  { %v2593_v45 = vpop.permute.xlu1 %554 }
 0x23c   :  { %1283 = vrot.lane.b32.xlu0 %v2545_v29, %s2212_s9 }
 0x23d   :  { %1285 = vrot.lane.b32.xlu1 %v2543_v27, %s2212_s9 }
 0x23e   :  { %v2599_v46 = vpop.permute.xlu0 %863 }
 0x23f   :  { %v2601_v41 = vpop.permute.xlu1 %865 }
 0x240   :  { %774 = vrot.lane.b32.xlu0 %v2605_v49, %s2206_s27 }
 0x241   :  { %776 = vrot.lane.b32.xlu1 %v2603_v48, %s2206_s27 }
 0x242   :  { %v2611_v44 = vpop.permute.xlu0 %653 }
 0x243   :  { %3267 = vst [vmem:[#allocation35_spill] sm:$0xff] %v2611_v44  ;;  %v2613_v51 = vpop.permute.xlu1 %655 }
 0x244   :  { %3268 = vst [vmem:[#allocation36_spill] sm:$0xff] %v2613_v51  ;;  %1085 = vrot.lane.b32.xlu0 %v2605_v49, %s2207_s30 }
 0x245   :  { %1087 = vrot.lane.b32.xlu1 %v2603_v48, %s2207_s30 }
 0x246   :  { %v965_v42 = vpop.permute.xlu0 %964 }
 0x247   :  { %v967_v54 = vpop.permute.xlu1 %966 }
 0x248   :  { %v2620_v55 = vsel %vm988_vm2, %v965_v42, %v967_v54  ;;  %572 = vrot.lane.b32.xlu0 %v2605_v49, %s2208_s6 }
 0x249   :  { %3269 = vst [vmem:[#allocation37_spill] sm:$0xff] %v2620_v55  ;;  %574 = vrot.lane.b32.xlu1 %v2603_v48, %s2208_s6 }
 0x24a   :  { %v759_v56 = vpop.permute.xlu0 %758 }
 0x24b   :  { %v761_v57 = vpop.permute.xlu1 %760 }
 0x24c   :  { %v2627_v58 = vsel %vm778_vm3, %v759_v56, %v761_v57  ;;  %883 = vrot.lane.b32.xlu0 %v2605_v49, %s2209_s1 }
 0x24d   :  { %885 = vrot.lane.b32.xlu1 %v2603_v48, %s2209_s1 }
 0x24e   :  { %v1070_v42 = vpop.permute.xlu0 %1069 }
 0x24f   :  { %v1072_v54 = vpop.permute.xlu1 %1071 }
 0x250   :  { %v2634_v60 = vsel %vm1089_vm4, %v1070_v42, %v1072_v54  ;;  %1275 = vrot.lane.b32.xlu0 %v2449_v3, %s2212_s9 }
 0x251   :  { %1277 = vrot.lane.b32.xlu1 %v2447_v2, %s2212_s9 }
 0x252   :  { %v557_v56 = vpop.permute.xlu0 %556 }
 0x253   :  { %v559_v57 = vpop.permute.xlu1 %558 }
 0x254   :  { %v2641_v5 = vsel %vm576_vm5, %v557_v56, %v559_v57  ;;  %1271 = vrot.lane.b32.xlu0 %v2421_v1, %s2212_s9 }
 0x255   :  { %1273 = vrot.lane.b32.xlu1 %v2419_v0, %s2212_s9 }
 0x256   :  { %v868_v42 = vpop.permute.xlu0 %867 }
 0x257   :  { %v870_v54 = vpop.permute.xlu1 %869 }
 0x258   :  { %v2648_v18 = vsel %vm887_vm6, %v868_v42, %v870_v54  ;;  %673 = vrot.lane.b32.xlu0 %v2605_v49, %s2210_s7 }
 0x259   :  { %675 = vrot.lane.b32.xlu1 %v2603_v48, %s2210_s7 }
 0x25a   :  { %v658_v56 = vpop.permute.xlu0 %657 }
 0x25b   :  { %v660_v57 = vpop.permute.xlu1 %659 }
 0x25c   :  { %v2655_v12 = vsel %vm677_vm7, %v658_v56, %v660_v57  ;;  %984 = vrot.lane.b32.xlu0 %v2605_v49, %s2211_s8 }
 0x25d   :  { %3270 = vst [vmem:[#allocation38_spill] sm:$0xff] %v2655_v12  ;;  %986 = vrot.lane.b32.xlu1 %v2603_v48, %s2211_s8 }
 0x25e   :  { %v969_v42 = vpop.permute.xlu0 %968 }
 0x25f   :  { %v971_v54 = vpop.permute.xlu1 %970 }
 0x260   :  { %v2662_v35 = vsel %vm988_vm2, %v969_v42, %v971_v54  ;;  %1267 = vrot.lane.b32.xlu0 %v2393_v63, %s2212_s9 }
 0x261   :  { %3271 = vst [vmem:[#allocation39_spill] sm:$0xff] %v2662_v35  ;;  %1269 = vrot.lane.b32.xlu1 %v2391_v62, %s2212_s9 }
 0x262   :  { %v763_v19 = vpop.permute.xlu0 %762 }
 0x263   :  { %v765_v56 = vpop.permute.xlu1 %764 }
 0x264   :  { %v2669_v57 = vsel %vm778_vm3, %v763_v19, %v765_v56  ;;  %1263 = vrot.lane.b32.xlu0 %v2365_v61, %s2212_s9 }
 0x265   :  { %1265 = vrot.lane.b32.xlu1 %v2363_v59, %s2212_s9 }
 0x266   :  { %v1074_v42 = vpop.permute.xlu0 %1073 }
 0x267   :  { %v1076_v54 = vpop.permute.xlu1 %1075 }
 0x268   :  { %v2676_v34 = vsel %vm1089_vm4, %v1074_v42, %v1076_v54  ;;  %1259 = vrot.lane.b32.xlu0 %v2325_v53, %s2212_s9 }
 0x269   :  { %1261 = vrot.lane.b32.xlu1 %v2323_v52, %s2212_s9 }
 0x26a   :  { %v561_v55 = vpop.permute.xlu0 %560 }
 0x26b   :  { %v563_v19 = vpop.permute.xlu1 %562 }
 0x26c   :  { %v2683_v56 = vsel %vm576_vm5, %v561_v55, %v563_v19  ;;  %1287 = vrot.lane.b32.xlu0 %v2605_v49, %s2212_s9 }
 0x26d   :  { %1289 = vrot.lane.b32.xlu1 %v2603_v48, %s2212_s9 }
 0x26e   :  { %v872_v20 = vpop.permute.xlu0 %871 }
 0x26f   :  { %v874_v42 = vpop.permute.xlu1 %873 }
 0x270   :  { %v2690_v54 = vsel %vm887_vm6, %v872_v20, %v874_v42  ;;  %1182 = vrot.lane.b32.xlu0 %v2545_v29, %s2213_s10 }
 0x271   :  { %1184 = vrot.lane.b32.xlu1 %v2543_v27, %s2213_s10 }
 0x272   :  { %v662_v55 = vpop.permute.xlu0 %661 }
 0x273   :  { %v664_v19 = vpop.permute.xlu1 %663 }
 0x274   :  { %v2697_v16 = vsel %vm677_vm7, %v662_v55, %v664_v19  ;;  %1178 = vrot.lane.b32.xlu0 %v2485_v10, %s2213_s10 }
 0x275   :  { %3272 = vst [vmem:[#allocation40_spill] sm:$0xff] %v2697_v16  ;;  %1180 = vrot.lane.b32.xlu1 %v2483_v9, %s2213_s10 }
 0x276   :  { %v973_v20 = vpop.permute.xlu0 %972 }
 0x277   :  { %v975_v42 = vpop.permute.xlu1 %974 }
 0x278   :  { %v2704_v17 = vsel %vm988_vm2, %v973_v20, %v975_v42  ;;  %1174 = vrot.lane.b32.xlu0 %v2449_v3, %s2213_s10 }
 0x279   :  { %3273 = vst [vmem:[#allocation41_spill] sm:$0xff] %v2704_v17  ;;  %1176 = vrot.lane.b32.xlu1 %v2447_v2, %s2213_s10  ;;  %v466_v17 = vlaneseq }
 0x27a   :  { %v767_v27 = vpop.permute.xlu0 %766 }
 0x27b   :  { %v769_v55 = vpop.permute.xlu1 %768  ;;  %v467_v44 = vand.u32 127, %v466_v17 }
 0x27c   :  { %v2711_v19 = vsel %vm778_vm3, %v767_v27, %v769_v55  ;;  %1186 = vrot.lane.b32.xlu0 %v2605_v49, %s2213_s10 }
 0x27d   :  { %1188 = vrot.lane.b32.xlu1 %v2603_v48, %s2213_s10  ;;  %v2769_v12 = vand.u32 15, %v467_v44 }
 0x27e   :  { %v1078_v9 = vpop.permute.xlu0 %1077 }
 0x27f   :  { %v1080_v20 = vpop.permute.xlu1 %1079  ;;  %v2784_v17 = vadd.s32 3, %v2769_v12  ;;  %v2791_v16 = vadd.s32 4294967293, %v2769_v12  ;;  %v2798_v10 = vadd.s32 1, %v2769_v12 }
 0x280   :  { %v2718_v42 = vsel %vm1089_vm4, %v1078_v9, %v1080_v20  ;;  %1170 = vrot.lane.b32.xlu0 %v2421_v1, %s2213_s10 }
 0x281   :  { %1172 = vrot.lane.b32.xlu1 %v2419_v0, %s2213_s10  ;;  %vm1038_vm10 = vcmp.lt.u32.totalorder %v2784_v17, 16  ;;  %vm525_vm11 = vcmp.lt.u32.totalorder %v2791_v16, 16  ;;  %vm836_vm12 = vcmp.lt.u32.totalorder %v2798_v10, 16  ;;  %v1090_v16 = vsel %vm1089_vm4, %v2479_v7, %v2481_v8  ;;  %v3282_v10 = vld [vmem:[#allocation26_spill] sm:$0xff]  ;;  %v3299_v17 = vld [vmem:[#allocation28_spill] sm:$0xff] }
 0x282   :  { %v2724_v2 = vpop.permute.xlu0 %564 }
 0x283   :  { %v2726_v27 = vpop.permute.xlu1 %566 }
 0x284   :  { %1166 = vrot.lane.b32.xlu0 %v2393_v63, %s2213_s10 }
 0x285   :  { %1168 = vrot.lane.b32.xlu1 %v2391_v62, %s2213_s10  ;;  %v1424_v62 = vld [vmem:[%s3230_s4] sm:$0xff] }
 0x286   :  { %v2732_v48 = vpop.permute.xlu0 %875 }
 0x287   :  { %v2734_v55 = vpop.permute.xlu1 %877 }
 0x288   :  { %1162 = vrot.lane.b32.xlu0 %v2365_v61, %s2213_s10  ;;  %v1425_v61 = vld [vmem:[%s3230_s4 + $0x8] sm:$0xff] }
 0x289   :  { %1164 = vrot.lane.b32.xlu1 %v2363_v59, %s2213_s10 }
 0x28a   :  { %v666_v0 = vpop.permute.xlu0 %665 }
 0x28b   :  { %v668_v9 = vpop.permute.xlu1 %667 }
 0x28c   :  { %v2741_v20 = vsel %vm677_vm7, %v666_v0, %v668_v9  ;;  %1158 = vrot.lane.b32.xlu0 %v2325_v53, %s2213_s10  ;;  %v1427_v53 = vld [vmem:[%s3230_s4 + $0x18] sm:$0xff] }
 0x28d   :  { %1160 = vrot.lane.b32.xlu1 %v2323_v52, %s2213_s10  ;;  %v1426_v52 = vld [vmem:[%s3230_s4 + $0x10] sm:$0xff]  ;;  %s2214_s4 = smov [#allocation10]  }
 0x28e   :  { %v977_v59 = vpop.permute.xlu0 %976  ;;  %s1712_s17 = sshll.u32 %s2214_s4, 4  ;;  %s1713_s17 = int_to_ptr.vmem [resolvable:$true] %s1712_s17 }
 0x28f   :  { %v979_v35 = vpop.permute.xlu1 %978  ;;  %s2169_s18 = scalar_lea.vmem %s1713_s17, 512  ;;  %p2174_p2 = scmp.lt.s32.totalorder %s1713_s17, %s1713_s17 }
 0x290   :  { %v2754_v28 = vsel %vm988_vm2, %v977_v59, %v979_v35  ;;  %1430 = vperm.xlu0 %2107, %v1424_v62   ;;  %p2170_p1 = scmp.ne.s32.totalorder %s1713_s17, %s2169_s18  ;;  %p2175_p3 = scmp.lt.s32.totalorder %s2169_s18, %s2169_s18 }
 0x291   :  { %3274 = vst [vmem:[#allocation42_spill] sm:$0xff] %v2754_v28  ;;  %1435 = vperm.xlu1 %2108, %v1425_v61  }
 0x292   :  { %v1280_v0 = vpop.permute.xlu0 %1279  ;;  %p2176_p4 = por %p2175_p3, %p2174_p2 }
 0x293   :  { %v1282_v9 = vpop.permute.xlu1 %1281 }
 0x294   :  { %v2763_v63 = vsel %vm1291_vm8, %v1280_v0, %v1282_v9  ;;  %1440 = vperm.xlu0 %2107, %v1426_v52   ;;  %p2177_p5 = pnand %p2176_p4, %p2170_p1 }
 0x295   :  { %3275 = vst [vmem:[#allocation43_spill] sm:$0xff] %v2763_v63  ;;  %1445 = vperm.xlu1 %2108, %v1427_v53   ;;  %v2776_v53 = vadd.s32 4294967295, %v2769_v12 }
 0x296   :  { %v771_v35 = vpop.permute.xlu0 %770 }
 0x297   :  { %v773_v59 = vpop.permute.xlu1 %772  ;;  %vm727_vm9 = vcmp.lt.u32.totalorder %v2776_v53, 16  ;;  %v3298_v53 = vld [vmem:[#allocation39_spill] sm:$0xff] }
 0x29a   :  { %v1082_v62 = vpop.permute.xlu0 %1081 }
 0x29b   :  { %v1084_v61 = vpop.permute.xlu1 %1083 }
 0x29e   :  { %v569_v32 = vpop.permute.xlu0 %568 }
 0x29f   :  { %v571_v33 = vpop.permute.xlu1 %570 }
 0x2a2   :  { %v880_v36 = vpop.permute.xlu0 %879 }
 0x2a3   :  { %v882_v1 = vpop.permute.xlu1 %881 }
 0x2a6   :  { %v2765_v51 = vpop.permute.xlu0 %669 }
 0x2a7   :  { %v2767_v28 = vpop.permute.xlu1 %671 }
 0x2aa   :  { %v2771_v0 = vpop.permute.xlu0 %980 }
 0x2ab   :  { %3276 = vst [vmem:[#allocation44_spill] sm:$0xff] %v2771_v0  ;;  %v2773_v52 = vpop.permute.xlu1 %982  ;;  %v785_v0 = vsel %vm778_vm3, %v771_v35, %v773_v59  ;;  %v3294_v59 = vld [vmem:[#allocation32_spill] sm:$0xff] }
 0x2ac   :  { %3277 = vst [vmem:[#allocation45_spill] sm:$0xff] %v2773_v52  ;;  %v583_v52 = vsel %vm576_vm5, %v569_v32, %v571_v33  ;;  %v1096_v32 = vsel %vm1089_vm4, %v1082_v62, %v1084_v61  ;;  %v894_v33 = vsel %vm887_vm6, %v880_v36, %v882_v1  ;;  %v893_v36 = vsel %vm887_vm6, %v2732_v48, %v2734_v55  ;;  %v3293_v55 = vld [vmem:[#allocation41_spill] sm:$0xff]  ;;  %v3295_v62 = vld [vmem:[#allocation31_spill] sm:$0xff] }
 0x2ad   :  { %v781_v1 = vsel %vm778_vm3, %v2575_v37, %v2577_v38  ;;  %v2863_v37 = vadd.s32 4294967294, %v2769_v12  ;;  %v679_v61 = vsel %vm677_vm7, %v3295_v62, %v3294_v59 }
 0x2ae   :  { %v2778_v9 = vpop.permute.xlu0 %1283 }
 0x2af   :  { %3278 = vst [vmem:[#allocation46_spill] sm:$0xff] %v2778_v9  ;;  %v2780_v63 = vpop.permute.xlu1 %1285  ;;  %vm626_vm13 = vcmp.lt.u32.totalorder %v2863_v37, 16  ;;  %v3307_v37 = vld [vmem:[#allocation30_spill] sm:$0xff] }
 0x2b0   :  { %3279 = vst [vmem:[#allocation47_spill] sm:$0xff] %v2780_v63 }
 0x2b2   :  { %v775_v47 = vpop.permute.xlu0 %774 }
 0x2b3   :  { %v777_v3 = vpop.permute.xlu1 %776 }
 0x2b4   :  { %v786_v44 = vsel %vm778_vm3, %v775_v47, %v777_v3 }
 0x2b5   :  { %1909 = vmatprep.subr.msk.mxu0 %vm727_vm9, %v786_v44 }
 0x2b6   :  { %v1086_v9 = vpop.permute.xlu0 %1085 }
 0x2b7   :  { %v1088_v50 = vpop.permute.xlu1 %1087 }
 0x2b8   :  { %v1097_v63 = vsel %vm1089_vm4, %v1086_v9, %v1088_v50  ;;  %v582_v9 = vsel %vm576_vm5, %v2724_v2, %v2726_v27  ;;  %v3292_v27 = vld [vmem:[#allocation19_spill] sm:$0xff] }
 0x2b9   :  { %1953 = vmatprep.subr.msk.mxu1 %vm1038_vm10, %v1097_v63 }
 0x2ba   :  { %v573_v47 = vpop.permute.xlu0 %572 }
 0x2bb   :  { %v575_v3 = vpop.permute.xlu1 %574 }
 0x2bc   :  { %v584_v44 = vsel %vm576_vm5, %v573_v47, %v575_v3  ;;  %v3300_v47 = vld [vmem:[#allocation27_spill] sm:$0xff] }
 0x2bd   :  { %1910 = vmatpush3.msk.msra.mxu0 %vm525_vm11, %v584_v44  ;;  %v678_v3 = vsel %vm677_vm7, %v3300_v47, %v3299_v17  ;;  %v3301_v44 = vld [vmem:[#allocation22_spill] sm:$0xff] }
 0x2be   :  { %1911 = vmatprep.subr.msk.mxu0 %vm727_vm9, %v785_v0  ;;  %v884_v50 = vpop.permute.xlu0 %883  ;;  %v3296_v0 = vld [vmem:[#allocation23_spill] sm:$0xff] }
 0x2bf   :  { %1912 = vmatpush3.msk.msra.mxu0 %vm525_vm11, %v583_v52  ;;  %v886_v63 = vpop.permute.xlu1 %885  ;;  %v3297_v52 = vld [vmem:[#allocation18_spill] sm:$0xff] }
 0x2c0   :  { %v895_v35 = vsel %vm887_vm6, %v884_v50, %v886_v63  ;;  %1913 = vmatprep.subr.msk.mxu0 %vm727_vm9, %v2711_v19  ;;  %v3302_v50 = vld [vmem:[#allocation17_spill] sm:$0xff]  ;;  %v1324_v63 = vld [vmem:[#allocation9] sm:$0xff] }
 0x2c1   :  { %1914 = vmatpush3.msk.msra.mxu0 %vm525_vm11, %v582_v9  ;;  %1954 = vmatpush3.msk.msra.mxu1 %vm836_vm12, %v895_v35  ;;  %v3021_v9 = vadd.s32 5, %v2769_v12 }
 0x2c2   :  { %1915 = vmatprep.subr.msk.mxu0 %vm727_vm9, %v2669_v57  ;;  %1955 = vmatprep.subr.msk.mxu1 %vm1038_vm10, %v1096_v32  ;;  %v2828_v2 = vpop.permute.xlu0 %1275  ;;  %v579_v57 = vsel %vm576_vm5, %v2591_v43, %v2593_v45  ;;  %v2878_v45 = vadd.s32 4294967292, %v2769_v12  ;;  %v3303_v32 = vld [vmem:[#allocation37_spill] sm:$0xff] }
 0x2c3   :  { %1916 = vmatpush3.msk.msra.mxu0 %vm525_vm11, %v2683_v56  ;;  %1956 = vmatpush3.msk.msra.mxu1 %vm836_vm12, %v894_v33  ;;  %v2835_v19 = vpop.permute.xlu1 %1277  ;;  %v3290_v56 = vld [vmem:[#allocation35_spill] sm:$0xff]  ;;  %vm1240_vm0 = vcmp.lt.u32.totalorder %v3021_v9, 16  ;;  %v1328_v9 = vld [vmem:[#allocation9 + $0x20] sm:$0xff] }
 0x2c4   :  { %1917 = vmatprep.subr.msk.mxu0 %vm727_vm9, %v2627_v58  ;;  %1957 = vmatprep.subr.msk.mxu1 %vm1038_vm10, %v2718_v42  ;;  %v578_v58 = vsel %vm576_vm5, %v2539_v25, %v2541_v26  ;;  %v577_v25 = vsel %vm576_vm5, %v2491_v11, %v2493_v13  ;;  %vm489_vm14 = vcmp.lt.u32.totalorder %v2878_v45, 16  ;;  %v3291_v42 = vld [vmem:[#allocation24_spill] sm:$0xff] }
 0x2c5   :  { %1918 = vmatpush3.msk.msra.mxu0 %vm525_vm11, %v2641_v5  ;;  %1958 = vmatpush3.msk.msra.mxu1 %vm836_vm12, %v893_v36  ;;  %v780_v5 = vsel %vm778_vm3, %v2523_v21, %v2525_v22  ;;  %v779_v21 = vsel %vm778_vm3, %v2471_v4, %v2473_v6  ;;  %v1092_v22 = vsel %vm1089_vm4, %v2583_v39, %v2585_v40  ;;  %v2911_v4 = vadd.s32 2, %v2769_v12  ;;  %v480_v36 = vld [vmem:[#allocation2] sm:$0xff] }
 0x2c6   :  { %1919 = vmatprep.subr.msk.mxu0 %vm727_vm9, %v781_v1  ;;  %1959 = vmatprep.subr.msk.mxu1 %vm1038_vm10, %v2676_v34  ;;  %v2868_v38 = vpop.permute.xlu0 %1271  ;;  %v1091_v6 = vsel %vm1089_vm4, %v2531_v23, %v2533_v24  ;;  %v888_v23 = vsel %vm887_vm6, %v2499_v14, %v2501_v15  ;;  %v684_v24 = vsel %vm677_vm7, %v2765_v51, %v2767_v28  ;;  %v3280_v28 = vld [vmem:[#allocation45_spill] sm:$0xff]  ;;  %v3281_v15 = vld [vmem:[#allocation44_spill] sm:$0xff]  ;;  %v3288_v51 = vld [vmem:[#allocation42_spill] sm:$0xff] }
 0x2c7   :  { %1920 = vmatpush3.msk.msra.mxu0 %vm525_vm11, %v579_v57  ;;  %1960 = vmatpush3.msk.msra.mxu1 %vm836_vm12, %v2690_v54  ;;  %v2875_v43 = vpop.permute.xlu1 %1273  ;;  %vm937_vm15 = vcmp.lt.u32.totalorder %v2911_v4, 16  ;;  %v3289_v34 = vld [vmem:[#allocation36_spill] sm:$0xff]  ;;  %v3304_v57 = vld [vmem:[#allocation34_spill] sm:$0xff] }
 0x2c8   :  { %1921 = vmatprep.subr.msk.mxu0 %vm727_vm9, %v780_v5  ;;  %1961 = vmatprep.subr.msk.mxu1 %vm1038_vm10, %v2634_v60  ;;  %v890_v60 = vsel %vm887_vm6, %v2599_v46, %v2601_v41  ;;  %v3285_v46 = vld [vmem:[#allocation25_spill] sm:$0xff]  ;;  %v3286_v41 = vld [vmem:[#allocation20_spill] sm:$0xff]  ;;  %v680_v54 = vsel %vm677_vm7, %v3290_v56, %v3289_v34 }
 0x2c9   :  { %1922 = vmatpush3.msk.msra.mxu0 %vm525_vm11, %v578_v58  ;;  %1962 = vmatpush3.msk.msra.mxu1 %vm836_vm12, %v2648_v18  ;;  %v889_v18 = vsel %vm887_vm6, %v2551_v30, %v2553_v31  ;;  %v995_v30 = vsel %vm988_vm2, %v3281_v15, %v3280_v28  ;;  %v3283_v31 = vld [vmem:[#allocation21_spill] sm:$0xff]  ;;  %v1330_v1 = vld [vmem:[#allocation9 + $0x30] sm:$0xff] }
 0x2ca   :  { %1923 = vmatprep.subr.msk.mxu0 %vm727_vm9, %v779_v21  ;;  %1963 = vmatprep.subr.msk.mxu1 %vm1038_vm10, %v1092_v22  ;;  %v674_v11 = vpop.permute.xlu0 %673  ;;  %v3305_v5 = vld [vmem:[#allocation33_spill] sm:$0xff]  ;;  %v3306_v21 = vld [vmem:[#allocation16_spill] sm:$0xff] }
 0x2cb   :  { %1924 = vmatpush3.msk.msra.mxu0 %vm525_vm11, %v577_v25  ;;  %1964 = vmatpush3.msk.msra.mxu1 %vm836_vm12, %v890_v60  ;;  %v676_v13 = vpop.permute.xlu1 %675  ;;  %v990_v58 = vsel %vm988_vm2, %v3305_v5, %v3304_v57  ;;  %v3308_v22 = vld [vmem:[#allocation29_spill] sm:$0xff]  ;;  %v3309_v60 = vld [vmem:[#allocation15_spill] sm:$0xff]  ;;  %v1334_v28 = vld [vmem:[#allocation9 + $0x50] sm:$0xff] }
 0x2cc   :  { %v685_v26 = vsel %vm677_vm7, %v674_v11, %v676_v13  ;;  %1965 = vmatprep.subr.msk.mxu1 %vm1038_vm10, %v1091_v6  ;;  %v989_v25 = vsel %vm988_vm2, %v3308_v22, %v3307_v37  ;;  %v1329_v6 = vld [vmem:[#allocation9 + $0x28] sm:$0xff]  ;;  %v1326_v11 = vld [vmem:[#allocation9 + $0x10] sm:$0xff]  ;;  %v1331_v15 = vld [vmem:[#allocation9 + $0x38] sm:$0xff] }
 0x2cd   :  { %1925 = vmatprep.subr.msk.mxu0 %vm626_vm13, %v685_v26  ;;  %1966 = vmatpush3.msk.msra.mxu1 %vm836_vm12, %v889_v18  ;;  %v3310_v26 = vld [vmem:[#allocation14_spill] sm:$0xff]  ;;  %v1342_v56 = vld [vmem:[#allocation9 + $0x90] sm:$0xff] }
 0x2ce   :  { %1926 = vmatpush3.msk.msra.mxu0 %vm489_vm14, %v2605_v49  ;;  %1967 = vmatprep.subr.msk.mxu1 %vm1038_vm10, %v1090_v16  ;;  %v985_v7 = vpop.permute.xlu0 %984  ;;  %v3287_v49 = vld [vmem:[#allocation38_spill] sm:$0xff]  ;;  %v1335_v16 = vld [vmem:[#allocation9 + $0x58] sm:$0xff] }
 0x2cf   :  { %1927 = vmatprep.subr.msk.mxu0 %vm626_vm13, %v684_v24  ;;  %1968 = vmatpush3.msk.msra.mxu1 %vm836_vm12, %v888_v23  ;;  %v987_v8 = vpop.permute.xlu1 %986  ;;  %v1332_v23 = vld [vmem:[#allocation9 + $0x40] sm:$0xff]  ;;  %v3311_v24 = vld [vmem:[#allocation47_spill] sm:$0xff] }
 0x2d0   :  { %v996_v14 = vsel %vm988_vm2, %v985_v7, %v987_v8  ;;  %1928 = vmatpush3.msk.msra.mxu0 %vm489_vm14, %v2545_v29  ;;  %v3284_v29 = vld [vmem:[#allocation40_spill] sm:$0xff]  ;;  %v3312_v7 = vld [vmem:[#allocation46_spill] sm:$0xff] }
 0x2d1   :  { %1929 = vmatprep.subr.msk.mxu0 %vm626_vm13, %v2741_v20  ;;  %1969 = vmatprep.subr.msk.mxu1 %vm937_vm15, %v996_v14  ;;  %v1298_v4 = vsel %vm1291_vm8, %v3312_v7, %v3311_v24 }
 0x2d2   :  { %1930 = vmatpush3.msk.msra.mxu0 %vm489_vm14, %v3282_v10  ;;  %1970 = vmatpush3.msra.mxu1 %v3283_v31  ;;  %v2966_v39 = vpop.permute.xlu0 %1267  ;;  %v3313_v31 = vld [vmem:[#allocation43_spill] sm:$0xff] }
 0x2d3   :  { %1931 = vmatprep.subr.msk.mxu0 %vm626_vm13, %v3284_v29  ;;  %1971 = vmatprep.subr.msk.mxu1 %vm937_vm15, %v995_v30  ;;  %v2973_v40 = vpop.permute.xlu1 %1269  ;;  %v1340_v29 = vld [vmem:[#allocation9 + $0x80] sm:$0xff] }
 0x2d4   :  { %1932 = vmatpush3.msk.msra.mxu0 %vm489_vm14, %v3285_v46  ;;  %1972 = vmatpush3.msra.mxu1 %v3286_v41  ;;  %v1337_v46 = vld [vmem:[#allocation9 + $0x68] sm:$0xff]  ;;  %v1296_v41 = vsel %vm1291_vm8, %v2828_v2, %v2835_v19  ;;  %v1295_v19 = vsel %vm1291_vm8, %v2868_v38, %v2875_v43 }
 0x2d5   :  { %1933 = vmatprep.subr.msk.mxu0 %vm626_vm13, %v3287_v49  ;;  %1973 = vmatprep.subr.msk.mxu1 %vm937_vm15, %v3288_v51  ;;  %v1339_v49 = vld [vmem:[#allocation9 + $0x78] sm:$0xff]  ;;  %v1336_v51 = vld [vmem:[#allocation9 + $0x60] sm:$0xff] }
 0x2d6   :  { %1934 = vmatpush3.msk.msra.mxu0 %vm489_vm14, %v3291_v42  ;;  %1974 = vmatpush3.msra.mxu1 %v3292_v27  ;;  %v2992_v48 = vpop.permute.xlu0 %1263  ;;  %v3112_v42 = vadd.s32 4, %v2769_v12  ;;  %v1341_v27 = vld [vmem:[#allocation9 + $0x88] sm:$0xff] }
 0x2d7   :  { %1935 = vmatprep.subr.msk.mxu0 %vm626_vm13, %v680_v54  ;;  %1975 = vmatprep.subr.msk.mxu1 %vm937_vm15, %v3293_v55  ;;  %v2999_v20 = vpop.permute.xlu1 %1265  ;;  %v1294_v54 = vsel %vm1291_vm8, %v2966_v39, %v2973_v40 }
 0x2d8   :  { %1936 = vmatpush3.msk.msra.mxu0 %vm489_vm14, %v3296_v0  ;;  %1976 = vmatpush3.msra.mxu1 %v3297_v52  ;;  %v1293_v39 = vsel %vm1291_vm8, %v2992_v48, %v2999_v20  ;;  %vm1139_vm2 = vcmp.lt.u32.totalorder %v3112_v42, 16 }
 0x2d9   :  { %1937 = vmatprep.subr.msk.mxu0 %vm626_vm13, %v679_v61  ;;  %1977 = vmatprep.subr.msk.mxu1 %vm937_vm15, %v3298_v53 }
 0x2da   :  { %1938 = vmatpush3.msk.msra.mxu0 %vm489_vm14, %v3301_v44  ;;  %1978 = vmatpush3.msra.mxu1 %v3302_v50  ;;  %v3023_v35 = vpop.permute.xlu0 %1259 }
 0x2db   :  { %1939 = vmatprep.subr.msk.mxu0 %vm626_vm13, %v678_v3  ;;  %1979 = vmatprep.subr.msk.mxu1 %vm937_vm15, %v3303_v32  ;;  %v3030_v33 = vpop.permute.xlu1 %1261  ;;  %v1333_v32 = vld [vmem:[#allocation9 + $0x48] sm:$0xff] }
 0x2dc   :  { %1940 = vmatpush3.msk.msra.mxu0 %vm489_vm14, %v480_v36  ;;  %1980 = vmatpush3.msra.mxu1 %v3306_v21  ;;  %v1292_v48 = vsel %vm1291_vm8, %v3023_v35, %v3030_v33  ;;  %v1338_v35 = vld [vmem:[#allocation9 + $0x70] sm:$0xff]  ;;  %v1343_v33 = vld [vmem:[#allocation9 + $0x98] sm:$0xff] }
 0x2dd   :  { %1513 = vmatmul.mubr.f32.vlgmr.msra.gmra.mxu0 %v1324_v63  ;;  %1981 = vmatprep.subr.msk.mxu1 %vm937_vm15, %v990_v58 }
 0x2de   :  { %1982 = vmatpush3.msra.mxu1 %v3309_v60  ;;  %1517 = vmatprep.mubr.f32.mxu0 %v1330_v1  ;;  %v1288_v13 = vpop.permute.xlu0 %1287 }
 0x2df   :  { %1983 = vmatprep.subr.msk.mxu1 %vm937_vm15, %v989_v25  ;;  %v1290_v45 = vpop.permute.xlu1 %1289 }
 0x2e0   :  { %v1299_v18 = vsel %vm1291_vm8, %v1288_v13, %v1290_v45  ;;  %1984 = vmatpush3.msra.mxu1 %v3310_v26 }
 0x2e1   :  { %1518 = vmatmul.mubr.f32.gmra.mxu0 %v1329_v6  ;;  %1598 = vmatmul.mubr.f32.vlgmr.msra.gmra.mxu1 %v1326_v11 }
 0x2e2   :  { %2017 = vmatprep.subr.msk.mxu0 %vm1240_vm0, %v1299_v18  ;;  %2055 = vmatprep.subr.msk.mxu1 %vm1240_vm0, %v1299_v18  ;;  %v3060_v8 = vpop.permute.xlu0 %1182 }
 0x2e3   :  { %2018 = vmatpush3.msk.msra.mxu0 %vm1240_vm0, %v1299_v18  ;;  %2071 = vmatpush3.msk.msra.mxu1 %vm1240_vm0, %v1299_v18  ;;  %v3062_v14 = vpop.permute.xlu1 %1184 }
 0x2e4   :  { %2019 = vmatprep.subr.msk.mxu0 %vm1240_vm0, %v1298_v4  ;;  %2056 = vmatprep.subr.msk.mxu1 %vm1240_vm0, %v1298_v4  ;;  %v1197_v62 = vsel %vm1190_vm1, %v3060_v8, %v3062_v14 }
 0x2e5   :  { %1522 = vmatprep.mubr.f32.mxu0 %v1335_v16  ;;  %1602 = vmatprep.mubr.f32.mxu1 %v1332_v23 }
 0x2e6   :  { %2020 = vmatpush3.msk.msra.mxu0 %vm1240_vm0, %v1298_v4  ;;  %2072 = vmatpush3.msk.msra.mxu1 %vm1240_vm0, %v1298_v4  ;;  %v3072_v30 = vpop.permute.xlu0 %1178 }
 0x2e7   :  { %1523 = vmatmul.mubr.f32.gmra.mxu0 %v1334_v28  ;;  %1603 = vmatmul.mubr.f32.gmra.mxu1 %v1331_v15  ;;  %v1181_v10 = vpop.permute.xlu1 %1180 }
 0x2e8   :  { %2021 = vmatprep.subr.msk.mxu0 %vm1240_vm0, %v3313_v31  ;;  %2057 = vmatprep.subr.msk.mxu1 %vm1240_vm0, %v3313_v31  ;;  %v1196_v61 = vsel %vm1190_vm1, %v3072_v30, %v1181_v10 }
 0x2e9   :  { %2022 = vmatpush3.msk.msra.mxu0 %vm1240_vm0, %v3313_v31  ;;  %2073 = vmatpush3.msk.msra.mxu1 %vm1240_vm0, %v3313_v31 }
 0x2ea   :  { %2023 = vmatprep.subr.msk.mxu0 %vm1240_vm0, %v1296_v41  ;;  %2058 = vmatprep.subr.msk.mxu1 %vm1240_vm0, %v1296_v41  ;;  %v1175_v34 = vpop.permute.xlu0 %1174 }
 0x2eb   :  { %1527 = vmatprep.mubr.f32.mxu0 %v1340_v29  ;;  %1607 = vmatprep.mubr.f32.mxu1 %v1337_v46  ;;  %v1177_v2 = vpop.permute.xlu1 %1176 }
 0x2ec   :  { %2024 = vmatpush3.msk.msra.mxu0 %vm1240_vm0, %v1296_v41  ;;  %2074 = vmatpush3.msk.msra.mxu1 %vm1240_vm0, %v1296_v41  ;;  %v1195_v53 = vsel %vm1190_vm1, %v1175_v34, %v1177_v2 }
 0x2ed   :  { %1528 = vmatmul.mubr.f32.gmra.mxu0 %v1339_v49  ;;  %1608 = vmatmul.mubr.f32.gmra.mxu1 %v1336_v51 }
 0x2ee   :  { %2025 = vmatprep.subr.msk.mxu0 %vm1240_vm0, %v1295_v19  ;;  %2059 = vmatprep.subr.msk.mxu1 %vm1240_vm0, %v1295_v19  ;;  %v1187_v38 = vpop.permute.xlu0 %1186 }
 0x2ef   :  { %2026 = vmatpush3.msk.msra.mxu0 %vm1240_vm0, %v1295_v19  ;;  %2075 = vmatpush3.msk.msra.mxu1 %vm1240_vm0, %v1295_v19  ;;  %v1189_v43 = vpop.permute.xlu1 %1188 }
 0x2f0   :  { %2027 = vmatprep.subr.msk.mxu0 %vm1240_vm0, %v1294_v54  ;;  %2060 = vmatprep.subr.msk.mxu1 %vm1240_vm0, %v1294_v54  ;;  %v1198_v55 = vsel %vm1190_vm1, %v1187_v38, %v1189_v43 }
 0x2f1   :  { %1612 = vmatprep.mubr.f32.mxu1 %v1342_v56  ;;  %2028 = vmatpush3.msk.msra.mxu0 %vm1240_vm0, %v1294_v54 }
 0x2f2   :  { %2076 = vmatpush3.msk.msra.mxu1 %vm1240_vm0, %v1294_v54  ;;  %2029 = vmatprep.subr.msk.mxu0 %vm1240_vm0, %v1293_v39  ;;  %v1171_v12 = vpop.permute.xlu0 %1170 }
 0x2f3   :  { %1613 = vmatmul.mubr.f32.gmra.mxu1 %v1341_v27  ;;  %2061 = vmatprep.subr.msk.mxu1 %vm1240_vm0, %v1293_v39  ;;  %v1173_v40 = vpop.permute.xlu1 %1172 }
 0x2f4   :  { %2030 = vmatpush3.msk.msra.mxu0 %vm1240_vm0, %v1293_v39  ;;  %2077 = vmatpush3.msk.msra.mxu1 %vm1240_vm0, %v1293_v39  ;;  %v1194_v17 = vsel %vm1190_vm1, %v1171_v12, %v1173_v40 }
 0x2f5   :  { %2031 = vmatprep.subr.msk.mxu0 %vm1240_vm0, %v1292_v48  ;;  %2062 = vmatprep.subr.msk.mxu1 %vm1240_vm0, %v1292_v48 }
 0x2f6   :  { %2032 = vmatpush3.msk.msra.mxu0 %vm1240_vm0, %v1292_v48  ;;  %2078 = vmatpush3.msk.msra.mxu1 %vm1240_vm0, %v1292_v48  ;;  %v1167_v20 = vpop.permute.xlu0 %1166 }
 0x2f7   :  { %2033 = vmatprep.subr.msk.mxu0 %vm1139_vm2, %v1198_v55  ;;  %2063 = vmatprep.subr.msk.mxu1 %vm1139_vm2, %v1198_v55  ;;  %v1169_v59 = vpop.permute.xlu1 %1168 }
 0x2f8   :  { %2034 = vmatpush3.msk.msra.mxu0 %vm1139_vm2, %v1198_v55  ;;  %2079 = vmatpush3.msk.msra.mxu1 %vm1139_vm2, %v1198_v55  ;;  %v1193_v44 = vsel %vm1190_vm1, %v1167_v20, %v1169_v59 }
 0x2f9   :  { %2035 = vmatprep.subr.msk.mxu0 %vm1139_vm2, %v1197_v62  ;;  %2064 = vmatprep.subr.msk.mxu1 %vm1139_vm2, %v1197_v62 }
 0x2fa   :  { %2036 = vmatpush3.msk.msra.mxu0 %vm1139_vm2, %v1197_v62  ;;  %2080 = vmatpush3.msk.msra.mxu1 %vm1139_vm2, %v1197_v62  ;;  %v1163_v0 = vpop.permute.xlu0 %1162 }
 0x2fb   :  { %2037 = vmatprep.subr.msk.mxu0 %vm1139_vm2, %v1196_v61  ;;  %2065 = vmatprep.subr.msk.mxu1 %vm1139_vm2, %v1196_v61  ;;  %v1165_v52 = vpop.permute.xlu1 %1164 }
 0x2fc   :  { %2038 = vmatpush3.msk.msra.mxu0 %vm1139_vm2, %v1196_v61  ;;  %2081 = vmatpush3.msk.msra.mxu1 %vm1139_vm2, %v1196_v61  ;;  %v1192_v50 = vsel %vm1190_vm1, %v1163_v0, %v1165_v52 }
 0x2fd   :  { %2039 = vmatprep.subr.msk.mxu0 %vm1139_vm2, %v1195_v53  ;;  %2066 = vmatprep.subr.msk.mxu1 %vm1139_vm2, %v1195_v53 }
 0x2fe   :  { %2040 = vmatpush3.msk.msra.mxu0 %vm1139_vm2, %v1195_v53  ;;  %2082 = vmatpush3.msk.msra.mxu1 %vm1139_vm2, %v1195_v53  ;;  %v1159_v47 = vpop.permute.xlu0 %1158 }
 0x2ff   :  { %2041 = vmatprep.subr.msk.mxu0 %vm1139_vm2, %v1194_v17  ;;  %2067 = vmatprep.subr.msk.mxu1 %vm1139_vm2, %v1194_v17  ;;  %v1161_v3 = vpop.permute.xlu1 %1160 }
 0x300   :  { %2042 = vmatpush3.msk.msra.mxu0 %vm1139_vm2, %v1194_v17  ;;  %2083 = vmatpush3.msk.msra.mxu1 %vm1139_vm2, %v1194_v17  ;;  %v1191_v63 = vsel %vm1190_vm1, %v1159_v47, %v1161_v3 }
 0x301   :  { %2043 = vmatprep.subr.msk.mxu0 %vm1139_vm2, %v1193_v44  ;;  %2068 = vmatprep.subr.msk.mxu1 %vm1139_vm2, %v1193_v44 }
 0x302   :  { %2044 = vmatpush3.msk.msra.mxu0 %vm1139_vm2, %v1193_v44  ;;  %2084 = vmatpush3.msk.msra.mxu1 %vm1139_vm2, %v1193_v44 }
 0x303   :  { %2045 = vmatprep.subr.msk.mxu0 %vm1139_vm2, %v1192_v50  ;;  %2069 = vmatprep.subr.msk.mxu1 %vm1139_vm2, %v1192_v50 }
 0x304   :  { %2046 = vmatpush3.msk.msra.mxu0 %vm1139_vm2, %v1192_v50  ;;  %2085 = vmatpush3.msk.msra.mxu1 %vm1139_vm2, %v1192_v50 }
 0x305   :  { %2047 = vmatprep.subr.msk.mxu0 %vm1139_vm2, %v1191_v63  ;;  %2070 = vmatprep.subr.msk.mxu1 %vm1139_vm2, %v1191_v63 }
 0x306   :  { %2048 = vmatpush3.msk.msra.mxu0 %vm1139_vm2, %v1191_v63  ;;  %2086 = vmatpush3.msk.msra.mxu1 %vm1139_vm2, %v1191_v63 }
 0x307   :  { %2049 = vmatprep.mubr.f32.mxu0 %v1328_v9  ;;  %2052 = vmatprep.mubr.f32.mxu1 %v1338_v35 }
 0x308   :  { %2050 = vmatmul.mubr.f32.vlgmr.msra.gmra.mxu0 %v1333_v32  ;;  %2053 = vmatmul.mubr.f32.vlgmr.msra.gmra.mxu1 %v1343_v33 }
 0x30b   :  { %v1431_v16 = vpop.permute.xlu0 %1430 }
 0x30c   :  { %v1436_v18 = vpop.permute.xlu1 %1435 }
 0x30f   :  { %v1441_v46 = vpop.permute.xlu0 %1440 }
 0x310   :  { %v1446_v15 = vpop.permute.xlu1 %1445 }
 0x39d   :  { %v1941_v36 = vpop.f32.mrf.mxu0 }
 0x39f   :  { %v1942_v57 = vpop.f32.mrf.mxu0 }
 0x3a0   :  { %v1943_v4 = vadd.f32 %v1942_v57, %v1941_v36 }
 0x3a1   :  { %v1985_v1 = vpop.f32.mrf.mxu1  ;;  %v1944_v58 = vpop.f32.mrf.mxu0 }
 0x3a2   :  { %v1515_v41 = vadd.f32 %v1943_v4, %v1431_v16 }
 0x3a3   :  { %v1986_v5 = vpop.f32.mrf.mxu1  ;;  %v1945_v37 = vpop.f32.mrf.mxu0 }
 0x3a4   :  { %v1946_v24 = vadd.f32 %v1945_v37, %v1944_v58  ;;  %v1987_v10 = vadd.f32 %v1986_v5, %v1985_v1 }
 0x3a6   :  { %v1520_v30 = vadd.f32 %v1946_v24, %v1436_v18  ;;  %v1600_v38 = vadd.f32 %v1987_v10, %v1515_v41 }
 0x3a7   :  { %v1988_v21 = vpop.f32.mrf.mxu1  ;;  %v1947_v25 = vpop.f32.mrf.mxu0 }
 0x3a9   :  { %v1989_v22 = vpop.f32.mrf.mxu1  ;;  %v1948_v6 = vpop.f32.mrf.mxu0 }
 0x3aa   :  { %v1949_v8 = vadd.f32 %v1948_v6, %v1947_v25  ;;  %v1990_v14 = vadd.f32 %v1989_v22, %v1988_v21 }
 0x3ac   :  { %v1525_v49 = vadd.f32 %v1949_v8, %v1441_v46  ;;  %v1605_v51 = vadd.f32 %v1990_v14, %v1520_v30 }
 0x3ad   :  { %v1991_v60 = vpop.f32.mrf.mxu1  ;;  %v1950_v13 = vpop.f32.mrf.mxu0 }
 0x3af   :  { %v1992_v11 = vpop.f32.mrf.mxu1  ;;  %v1951_v26 = vpop.f32.mrf.mxu0 }
 0x3b0   :  { %v1952_v7 = vadd.f32 %v1951_v26, %v1950_v13  ;;  %v1993_v29 = vadd.f32 %v1992_v11, %v1991_v60 }
 0x3b2   :  { %v1530_v31 = vadd.f32 %v1952_v7, %v1446_v15  ;;  %v1610_v43 = vadd.f32 %v1993_v29, %v1525_v49 }
 0x3b3   :  { %v1994_v45 = vpop.f32.mrf.mxu1 }
 0x3b5   :  { %v1995_v23 = vpop.f32.mrf.mxu1 }
 0x3b6   :  { %v1996_v28 = vadd.f32 %v1995_v23, %v1994_v45 }
 0x3b8   :  { %v1615_v34 = vadd.f32 %v1996_v28, %v1530_v31 }
 0x3c8   :  { %v2051_v2 = vpop.f32.mrf.mxu0  ;;  %v2054_v19 = vpop.f32.mrf.mxu1 }
 0x3c9   :  { %v1690_v56 = vadd.f32 %v2051_v2, %v1605_v51  ;;  %v1700_v54 = vadd.f32 %v2054_v19, %v1615_v34 }
 0x3ca   :  { %v1684_v42 = vpop.f32.mrf.mxu0  ;;  %v1694_v27 = vpop.f32.mrf.mxu1 }
 0x3cb   :  { %1704 = vst [vmem:[#allocation10 + $0x8] sm:$0xff] %v1690_v56  ;;  %1706 = vst [vmem:[#allocation10 + $0x18] sm:$0xff] %v1700_v54  ;;  %v1685_v39 = vadd.f32 %v1684_v42, %v1600_v38  ;;  %v1695_v12 = vadd.f32 %v1694_v27, %v1610_v43 }
 0x3cd   :  { %1703 = vst [vmem:[#allocation10] sm:$0xff] %v1685_v39  ;;  %1705 = vst [vmem:[#allocation10 + $0x10] sm:$0xff] %v1695_v12 }
 0x3ce   :  { %2180 = shalt.err (!%p2177_p5)
}
 0x3cf   :  { %1718 = dma.vmem_to_hbm [thread:$0]  %s1713_s17, 512, %s3231_s5, [#allocation6], %s2199_s28, %s2199_s28, %s2200_s29  }
 0x3d0   :  { %2193 = dma.done.wait [#allocation6], 512  }
 0x3d1   :  { %2194 = vsyncadd [#allocation6], 4294966784 }
 0x3d2   :  { %1722 = vsyncpa [#allocation5], 1 }
 0x3d3   :  { %1723 = vsyncpa [#allocation8], 1 }
 0x3d4   :  { %1724 = vsyncpa [#allocation6], 1 }

</bundles_post_ra>
